<compile_context>
chip_gen: v7x
topology: tpu7x:2x2x1
jax: 0.10.0
libtpu: 0.0.40
codegen_flags: <defaults>
</compile_context>

<pallas_src>
import jax
import jax.numpy as jnp
from jax.experimental import pallas as pl
from jax.experimental.pallas import tpu as pltpu

KSIZE = 7
PAD = (KSIZE - 1) // 2


def _build_band(conv_w, H, W, dtype=jnp.bfloat16):
    """Conv3d(2,1,7,pad=3) weight (1,2,K,K,K) -> (K, 2*H*W, H*W) band matrices.

    band[kd, c*H*W + h'*W + w', h*W + w] = conv_w[0, c, kd, h'-h+PAD, w'-w+PAD]
    when both offsets lie in [0, K), else 0 — i.e. the H/W zero-padding of the
    convolution is folded into the band; only the depth axis needs a halo.
    """
    K = KSIZE
    wgt = conv_w[0].astype(jnp.float32)                                  # (2,K,K,K)
    kh = jnp.arange(H)[:, None] - jnp.arange(H)[None, :] + PAD           # (H,H) [h',h]
    kw = jnp.arange(W)[:, None] - jnp.arange(W)[None, :] + PAD           # (W,W) [w',w]
    vh = (kh >= 0) & (kh < K)
    vw = (kw >= 0) & (kw < K)
    khc = jnp.clip(kh, 0, K - 1)
    kwc = jnp.clip(kw, 0, K - 1)
    b = wgt[:, :, khc, :]                 # (2,K,H,H,K)      [c,kd,h',h,kw]
    b = b[:, :, :, :, kwc]                # (2,K,H,H,W,W)    [c,kd,h',h,w',w]
    mask = (vh[:, :, None, None] & vw[None, None, :, :]).astype(jnp.float32)
    b = b * mask[None, None]
    b = jnp.transpose(b, (1, 0, 2, 4, 3, 5))   # (K,2,H,W,H,W) [kd,c,h',w',h,w]
    return b.reshape(K, 2 * H * W, H * W).astype(dtype)


def _cbam_kernel(x_ref, w1_ref, w2_ref, band_ref, o_ref, pad_ref):
    C, D, HW = x_ref.shape[1], x_ref.shape[2], x_ref.shape[3]
    xb = x_ref[0].astype(jnp.float32)                                   # (C, D, HW)

    # ---------------- ChannelAttention ----------------
    avg_c = jnp.mean(jnp.mean(xb, axis=2), axis=1, keepdims=True)       # (C, 1)
    max_c = jnp.max(jnp.max(xb, axis=2), axis=1, keepdims=True)         # (C, 1)
    pooled = jnp.concatenate([avg_c, max_c], axis=1)                    # (C, 2)
    hid = jnp.maximum(
        jnp.dot(w1_ref[...], pooled, preferred_element_type=jnp.float32), 0.0)  # (Cr, 2)
    catt = jnp.dot(w2_ref[...], hid, preferred_element_type=jnp.float32)         # (C, 2)
    ca = jax.nn.sigmoid(catt[:, 0:1] + catt[:, 1:2])                    # (C, 1)
    y = xb * ca[:, :, None]                                             # (C, D, HW)

    # ---------------- SpatialAttention ----------------
    slab_avg = jnp.mean(y, axis=0)                                      # (D, HW)
    slab_max = jnp.max(y, axis=0)                                       # (D, HW)

    # Depth-padded, channel-concatenated conv input; only the halo is zeroed
    # each step (interior is fully overwritten).
    halo = jnp.zeros((PAD, 2 * HW), jnp.float32)
    pad_ref[0:PAD, :] = halo
    pad_ref[PAD + D:, :] = halo
    pad_ref[PAD:PAD + D, 0:HW] = slab_avg
    pad_ref[PAD:PAD + D, HW:2 * HW] = slab_max

    # 7x7x7 conv == 7 accumulating matmuls against the (H,W)-plane band
    # (bf16 MXU inputs, f32 accumulation).  kd is static -> aligned slices.
    acc = jnp.dot(pad_ref[0:D, :].astype(jnp.bfloat16), band_ref[0],
                  preferred_element_type=jnp.float32)                   # (D, HW)
    for kd in range(1, KSIZE):
        lhs = pad_ref[kd:kd + D, :].astype(jnp.bfloat16)                # (D, 2*HW)
        acc = acc + jnp.dot(lhs, band_ref[kd],
                            preferred_element_type=jnp.float32)        # (D, HW)
    sa = jax.nn.sigmoid(acc)                                            # (D, HW)

    o_ref[0] = (y * sa[None, :, :]).astype(o_ref.dtype)                 # (C, D, HW)


@jax.jit
def cbam(x, w1, w2, conv_w):
    """Forward of the PyTorch CBAM module.

    x:      (N, C, D, H, W)
    w1:     ChannelAttention.fc[0].weight, (C//ratio, C, 1, 1, 1), bias=False
    w2:     ChannelAttention.fc[2].weight, (C, C//ratio, 1, 1, 1), bias=False
    conv_w: SpatialAttention.conv.weight,  (1, 2, 7, 7, 7),         bias=False
    """
    N, C, D, H, W = x.shape
    HW = H * W
    Cr = w1.shape[0]
    Dp = D + 2 * PAD

    x_flat = x.reshape(N, C, D, HW)                       # free metadata reshape
    w1m = w1.reshape(Cr, C).astype(jnp.float32)
    w2m = w2.reshape(C, Cr).astype(jnp.float32)
    band = _build_band(conv_w, H, W, jnp.bfloat16)        # (K, 2*HW, HW)

    out = pl.pallas_call(
        _cbam_kernel,
        out_shape=jax.ShapeDtypeStruct((N, C, D, HW), x.dtype),
        grid_spec=pltpu.PrefetchScalarGridSpec(
            num_scalar_prefetch=0,
            grid=(N,),
            in_specs=[
                pl.BlockSpec((1, C, D, HW), lambda n: (n, 0, 0, 0)),
                pl.BlockSpec((Cr, C), lambda n: (0, 0)),
                pl.BlockSpec((C, Cr), lambda n: (0, 0)),
                pl.BlockSpec((KSIZE, 2 * HW, HW), lambda n: (0, 0, 0)),
            ],
            out_specs=pl.BlockSpec((1, C, D, HW), lambda n: (n, 0, 0, 0)),
            scratch_shapes=[pltpu.VMEM((Dp, 2 * HW), jnp.float32)],
        ),
        compiler_params=pltpu.CompilerParams(
            dimension_semantics=("parallel",),
            vmem_limit_bytes=32 * 1024 * 1024),
    )(x_flat, w1m, w2m, band)
    return out.reshape(N, C, D, H, W)


def cbam_ref(x, w1, w2, conv_w):
    """Pure-JAX (f32) reference matching the PyTorch CBAM forward."""
    N, C, D, H, W = x.shape
    Cr = w1.shape[0]
    w1m = w1.reshape(Cr, C)
    w2m = w2.reshape(C, Cr)

    avg = jnp.mean(x, axis=(2, 3, 4))                     # (N, C)
    mx = jnp.max(x, axis=(2, 3, 4))                       # (N, C)

    def fc(v):
        return jnp.maximum(v @ w1m.T, 0.0) @ w2m.T

    ca = jax.nn.sigmoid(fc(avg) + fc(mx))                 # (N, C)
    y = x * ca[:, :, None, None, None]

    y_avg = jnp.mean(y, axis=1, keepdims=True)
    y_max = jnp.max(y, axis=1, keepdims=True)
    yc = jnp.concatenate([y_avg, y_max], axis=1)          # (N, 2, D, H, W)
    conv = jax.lax.conv_general_dilated(
        yc, conv_w, window_strides=(1, 1, 1),
        padding=[(PAD, PAD)] * 3,
        dimension_numbers=("NCDHW", "OIDHW", "NCDHW"))
    sa = jax.nn.sigmoid(conv)                             # (N, 1, D, H, W)
    return sa * y


if __name__ == "__main__":
    key = jax.random.PRNGKey(0)
    kx, k1, k2, kc = jax.random.split(key, 4)

    N, C, D, H, W = 2, 32, 8, 8, 8
    RATIO = 16
    Cr = C // RATIO

    x = jax.random.normal(kx, (N, C, D, H, W), jnp.float32)

    # ChannelAttention 1x1x1 conv weights (bias=False), kaiming-uniform-style init.
    b1 = 1.0 / (C ** 0.5)
    w1 = jax.random.uniform(k1, (Cr, C, 1, 1, 1), jnp.float32, minval=-b1, maxval=b1)
    b2 = 1.0 / (Cr ** 0.5)
    w2 = jax.random.uniform(k2, (C, Cr, 1, 1, 1), jnp.float32, minval=-b2, maxval=b2)

    # SpatialAttention Conv3d(2, 1, 7, padding=3, bias=False) weight.
    fan_in = 2 * KSIZE ** 3
    bc = 1.0 / (fan_in ** 0.5)
    conv_w = jax.random.uniform(kc, (1, 2, KSIZE, KSIZE, KSIZE), jnp.float32,
                                minval=-bc, maxval=bc)

    out = jax.block_until_ready(cbam(x, w1, w2, conv_w))
    ref = jax.block_until_ready(cbam_ref(x, w1, w2, conv_w))

    assert out.shape == (N, C, D, H, W), out.shape
    max_err = float(jnp.max(jnp.abs(out - ref)))
    # bf16 MXU inputs for the 7x7x7 conv (f32 accumulate) bound the error well
    # inside this tolerance; everything else is computed in f32.
    assert jnp.allclose(out, ref, atol=5e-3, rtol=5e-3), max_err
    print("KERNEL_OK")
</pallas_src>

<mosaic_0001>
module attributes {stable_mosaic.version = 11 : i64} {
  func.func @_cbam_kernel(%arg0: i32, %arg1: memref<1x32x8x64xf32, #tpu.memory_space<vmem>>, %arg2: memref<2x32xf32, #tpu.memory_space<vmem>>, %arg3: memref<32x2xf32, #tpu.memory_space<vmem>>, %arg4: memref<7x128x64xbf16, #tpu.memory_space<vmem>>, %arg5: memref<1x32x8x64xf32, #tpu.memory_space<vmem>>, %arg6: memref<14x128xf32, #tpu.memory_space<vmem>>) attributes {dimension_semantics = [#tpu.dimension_semantics<parallel>], iteration_bounds = array<i64: 2>, scalar_prefetch = 0 : i64, scratch_operands = 1 : i64, tpu.core_type = #tpu.core_type<tc>, window_params = [{transform_indices = @transform_0, window_bounds = array<i64: 1, 32, 8, 64>}, {pipeline_mode = #tpu.pipeline_mode<synchronous>, transform_indices = @transform_1, window_bounds = array<i64: 2, 32>}, {pipeline_mode = #tpu.pipeline_mode<synchronous>, transform_indices = @transform_2, window_bounds = array<i64: 32, 2>}, {pipeline_mode = #tpu.pipeline_mode<synchronous>, transform_indices = @transform_3, window_bounds = array<i64: 7, 128, 64>}, {transform_indices = @transform_4, window_bounds = array<i64: 1, 32, 8, 64>}]} {
    %c0 = arith.constant 0 : index
    %c0_0 = arith.constant 0 : index
    %c0_1 = arith.constant 0 : index
    %c0_2 = arith.constant 0 : index
    %0 = vector.load %arg1[%c0, %c0_0, %c0_1, %c0_2] : memref<1x32x8x64xf32, #tpu.memory_space<vmem>>, vector<1x32x8x64xf32>
    %1 = vector.shape_cast %0 : vector<1x32x8x64xf32> to vector<32x8x64xf32>
    %cst = arith.constant dense<0.000000e+00> : vector<32x8xf32>
    %2 = vector.multi_reduction <add>, %1, %cst [2] : vector<32x8x64xf32> to vector<32x8xf32>
    %cst_3 = arith.constant 6.400000e+01 : f32
    %3 = vector.broadcast %cst_3 : f32 to vector<32x8xf32>
    %4 = arith.divf %2, %3 : vector<32x8xf32>
    %cst_4 = arith.constant dense<0.000000e+00> : vector<32xf32>
    %5 = vector.multi_reduction <add>, %4, %cst_4 [1] : vector<32x8xf32> to vector<32xf32>
    %6 = vector.shape_cast %5 : vector<32xf32> to vector<32x1xf32>
    %cst_5 = arith.constant 8.000000e+00 : f32
    %7 = vector.broadcast %cst_5 : f32 to vector<32x1xf32>
    %8 = arith.divf %6, %7 : vector<32x1xf32>
    %cst_6 = arith.constant dense<0xFF800000> : vector<32x8xf32>
    %9 = vector.multi_reduction <maximumf>, %1, %cst_6 [2] : vector<32x8x64xf32> to vector<32x8xf32>
    %cst_7 = arith.constant dense<0xFF800000> : vector<32xf32>
    %10 = vector.multi_reduction <maximumf>, %9, %cst_7 [1] : vector<32x8xf32> to vector<32xf32>
    %11 = vector.shape_cast %10 : vector<32xf32> to vector<32x1xf32>
    %12 = tpu.concatenate %8, %11 in 1 : vector<32x1xf32>, vector<32x1xf32> -> vector<32x2xf32>
    %c0_8 = arith.constant 0 : index
    %c0_9 = arith.constant 0 : index
    %13 = vector.load %arg2[%c0_8, %c0_9] : memref<2x32xf32, #tpu.memory_space<vmem>>, vector<2x32xf32>
    %cst_10 = arith.constant dense<0.000000e+00> : vector<2x2xf32>
    %14 = tpu.matmul %13, %12, %cst_10 {dimension_numbers = #tpu.dot_dimension_numbers<[1], [0], [0], [1], [0, 0, 1, 1], [], []>} : vector<2x32xf32>, vector<32x2xf32>, vector<2x2xf32> -> vector<2x2xf32>
    %cst_11 = arith.constant 0.000000e+00 : f32
    %15 = vector.broadcast %cst_11 : f32 to vector<2x2xf32>
    %16 = arith.maximumf %14, %15 : vector<2x2xf32>
    %c0_12 = arith.constant 0 : index
    %c0_13 = arith.constant 0 : index
    %17 = vector.load %arg3[%c0_12, %c0_13] : memref<32x2xf32, #tpu.memory_space<vmem>>, vector<32x2xf32>
    %cst_14 = arith.constant dense<0.000000e+00> : vector<32x2xf32>
    %18 = tpu.matmul %17, %16, %cst_14 {dimension_numbers = #tpu.dot_dimension_numbers<[1], [0], [0], [1], [0, 0, 1, 1], [], []>} : vector<32x2xf32>, vector<2x2xf32>, vector<32x2xf32> -> vector<32x2xf32>
    %19 = vector.extract_strided_slice %18 {offsets = [0, 0], sizes = [32, 1], strides = [1, 1]} : vector<32x2xf32> to vector<32x1xf32>
    %20 = vector.extract_strided_slice %18 {offsets = [0, 1], sizes = [32, 1], strides = [1, 1]} : vector<32x2xf32> to vector<32x1xf32>
    %21 = arith.addf %19, %20 : vector<32x1xf32>
    %22 = arith.negf %21 : vector<32x1xf32>
    %23 = math.exp %22 : vector<32x1xf32>
    %cst_15 = arith.constant 1.000000e+00 : f32
    %24 = vector.broadcast %cst_15 : f32 to vector<32x1xf32>
    %25 = arith.addf %24, %23 : vector<32x1xf32>
    %26 = arith.divf %24, %25 : vector<32x1xf32>
    %27 = vector.shape_cast %26 : vector<32x1xf32> to vector<32x1x1xf32>
    %28 = vector.broadcast %27 : vector<32x1x1xf32> to vector<32x8x64xf32>
    %29 = arith.mulf %1, %28 : vector<32x8x64xf32>
    %cst_16 = arith.constant dense<0.000000e+00> : vector<8x64xf32>
    %30 = vector.multi_reduction <add>, %29, %cst_16 [0] : vector<32x8x64xf32> to vector<8x64xf32>
    %cst_17 = arith.constant 3.200000e+01 : f32
    %31 = vector.broadcast %cst_17 : f32 to vector<8x64xf32>
    %32 = arith.divf %30, %31 : vector<8x64xf32>
    %cst_18 = arith.constant dense<0xFF800000> : vector<8x64xf32>
    %33 = vector.multi_reduction <maximumf>, %29, %cst_18 [0] : vector<32x8x64xf32> to vector<8x64xf32>
    %cst_19 = arith.constant 0.000000e+00 : f32
    %34 = vector.broadcast %cst_19 : f32 to vector<3x128xf32>
    %c0_20 = arith.constant 0 : index
    %c0_21 = arith.constant 0 : index
    %35 = vector.load %arg6[%c0_20, %c0_21] : memref<14x128xf32, #tpu.memory_space<vmem>>, vector<3x128xf32>
    tpu.vector_store %arg6[%c0_20, %c0_21], %34 {strides = array<i32>} : memref<14x128xf32, #tpu.memory_space<vmem>>, vector<3x128xf32>,
    %c11 = arith.constant 11 : index
    %c0_22 = arith.constant 0 : index
    %36 = vector.load %arg6[%c11, %c0_22] : memref<14x128xf32, #tpu.memory_space<vmem>>, vector<3x128xf32>
    tpu.vector_store %arg6[%c11, %c0_22], %34 {strides = array<i32>} : memref<14x128xf32, #tpu.memory_space<vmem>>, vector<3x128xf32>,
    %c3 = arith.constant 3 : index
    %c0_23 = arith.constant 0 : index
    %37 = vector.load %arg6[%c3, %c0_23] : memref<14x128xf32, #tpu.memory_space<vmem>>, vector<8x64xf32>
    tpu.vector_store %arg6[%c3, %c0_23], %32 {strides = array<i32>} : memref<14x128xf32, #tpu.memory_space<vmem>>, vector<8x64xf32>,
    %c3_24 = arith.constant 3 : index
    %c64 = arith.constant 64 : index
    %38 = vector.load %arg6[%c3_24, %c64] : memref<14x128xf32, #tpu.memory_space<vmem>>, vector<8x64xf32>
    tpu.vector_store %arg6[%c3_24, %c64], %33 {strides = array<i32>} : memref<14x128xf32, #tpu.memory_space<vmem>>, vector<8x64xf32>,
    %c0_25 = arith.constant 0 : index
    %c0_26 = arith.constant 0 : index
    %39 = vector.load %arg6[%c0_25, %c0_26] : memref<14x128xf32, #tpu.memory_space<vmem>>, vector<8x128xf32>
    %40 = arith.truncf %39 : vector<8x128xf32> to vector<8x128xbf16>
    %c0_27 = arith.constant 0 : index
    %c0_28 = arith.constant 0 : index
    %c0_29 = arith.constant 0 : index
    %41 = vector.load %arg4[%c0_27, %c0_28, %c0_29] : memref<7x128x64xbf16, #tpu.memory_space<vmem>>, vector<1x128x64xbf16>
    %42 = vector.shape_cast %41 : vector<1x128x64xbf16> to vector<128x64xbf16>
    %cst_30 = arith.constant dense<0.000000e+00> : vector<8x64xf32>
    %43 = tpu.matmul %40, %42, %cst_30 {dimension_numbers = #tpu.dot_dimension_numbers<[1], [0], [0], [1], [0, 0, 1, 1], [], []>} : vector<8x128xbf16>, vector<128x64xbf16>, vector<8x64xf32> -> vector<8x64xf32>
    %c1 = arith.constant 1 : index
    %c0_31 = arith.constant 0 : index
    %44 = vector.load %arg6[%c1, %c0_31] : memref<14x128xf32, #tpu.memory_space<vmem>>, vector<8x128xf32>
    %45 = arith.truncf %44 : vector<8x128xf32> to vector<8x128xbf16>
    %c1_32 = arith.constant 1 : index
    %c0_33 = arith.constant 0 : index
    %c0_34 = arith.constant 0 : index
    %46 = vector.load %arg4[%c1_32, %c0_33, %c0_34] : memref<7x128x64xbf16, #tpu.memory_space<vmem>>, vector<1x128x64xbf16>
    %47 = vector.shape_cast %46 : vector<1x128x64xbf16> to vector<128x64xbf16>
    %cst_35 = arith.constant dense<0.000000e+00> : vector<8x64xf32>
    %48 = tpu.matmul %45, %47, %cst_35 {dimension_numbers = #tpu.dot_dimension_numbers<[1], [0], [0], [1], [0, 0, 1, 1], [], []>} : vector<8x128xbf16>, vector<128x64xbf16>, vector<8x64xf32> -> vector<8x64xf32>
    %49 = arith.addf %43, %48 : vector<8x64xf32>
    %c2 = arith.constant 2 : index
    %c0_36 = arith.constant 0 : index
    %50 = vector.load %arg6[%c2, %c0_36] : memref<14x128xf32, #tpu.memory_space<vmem>>, vector<8x128xf32>
    %51 = arith.truncf %50 : vector<8x128xf32> to vector<8x128xbf16>
    %c2_37 = arith.constant 2 : index
    %c0_38 = arith.constant 0 : index
    %c0_39 = arith.constant 0 : index
    %52 = vector.load %arg4[%c2_37, %c0_38, %c0_39] : memref<7x128x64xbf16, #tpu.memory_space<vmem>>, vector<1x128x64xbf16>
    %53 = vector.shape_cast %52 : vector<1x128x64xbf16> to vector<128x64xbf16>
    %cst_40 = arith.constant dense<0.000000e+00> : vector<8x64xf32>
    %54 = tpu.matmul %51, %53, %cst_40 {dimension_numbers = #tpu.dot_dimension_numbers<[1], [0], [0], [1], [0, 0, 1, 1], [], []>} : vector<8x128xbf16>, vector<128x64xbf16>, vector<8x64xf32> -> vector<8x64xf32>
    %55 = arith.addf %49, %54 : vector<8x64xf32>
    %c3_41 = arith.constant 3 : index
    %c0_42 = arith.constant 0 : index
    %56 = vector.load %arg6[%c3_41, %c0_42] : memref<14x128xf32, #tpu.memory_space<vmem>>, vector<8x128xf32>
    %57 = arith.truncf %56 : vector<8x128xf32> to vector<8x128xbf16>
    %c3_43 = arith.constant 3 : index
    %c0_44 = arith.constant 0 : index
    %c0_45 = arith.constant 0 : index
    %58 = vector.load %arg4[%c3_43, %c0_44, %c0_45] : memref<7x128x64xbf16, #tpu.memory_space<vmem>>, vector<1x128x64xbf16>
    %59 = vector.shape_cast %58 : vector<1x128x64xbf16> to vector<128x64xbf16>
    %cst_46 = arith.constant dense<0.000000e+00> : vector<8x64xf32>
    %60 = tpu.matmul %57, %59, %cst_46 {dimension_numbers = #tpu.dot_dimension_numbers<[1], [0], [0], [1], [0, 0, 1, 1], [], []>} : vector<8x128xbf16>, vector<128x64xbf16>, vector<8x64xf32> -> vector<8x64xf32>
    %61 = arith.addf %55, %60 : vector<8x64xf32>
    %c4 = arith.constant 4 : index
    %c0_47 = arith.constant 0 : index
    %62 = vector.load %arg6[%c4, %c0_47] : memref<14x128xf32, #tpu.memory_space<vmem>>, vector<8x128xf32>
    %63 = arith.truncf %62 : vector<8x128xf32> to vector<8x128xbf16>
    %c4_48 = arith.constant 4 : index
    %c0_49 = arith.constant 0 : index
    %c0_50 = arith.constant 0 : index
    %64 = vector.load %arg4[%c4_48, %c0_49, %c0_50] : memref<7x128x64xbf16, #tpu.memory_space<vmem>>, vector<1x128x64xbf16>
    %65 = vector.shape_cast %64 : vector<1x128x64xbf16> to vector<128x64xbf16>
    %cst_51 = arith.constant dense<0.000000e+00> : vector<8x64xf32>
    %66 = tpu.matmul %63, %65, %cst_51 {dimension_numbers = #tpu.dot_dimension_numbers<[1], [0], [0], [1], [0, 0, 1, 1], [], []>} : vector<8x128xbf16>, vector<128x64xbf16>, vector<8x64xf32> -> vector<8x64xf32>
    %67 = arith.addf %61, %66 : vector<8x64xf32>
    %c5 = arith.constant 5 : index
    %c0_52 = arith.constant 0 : index
    %68 = vector.load %arg6[%c5, %c0_52] : memref<14x128xf32, #tpu.memory_space<vmem>>, vector<8x128xf32>
    %69 = arith.truncf %68 : vector<8x128xf32> to vector<8x128xbf16>
    %c5_53 = arith.constant 5 : index
    %c0_54 = arith.constant 0 : index
    %c0_55 = arith.constant 0 : index
    %70 = vector.load %arg4[%c5_53, %c0_54, %c0_55] : memref<7x128x64xbf16, #tpu.memory_space<vmem>>, vector<1x128x64xbf16>
    %71 = vector.shape_cast %70 : vector<1x128x64xbf16> to vector<128x64xbf16>
    %cst_56 = arith.constant dense<0.000000e+00> : vector<8x64xf32>
    %72 = tpu.matmul %69, %71, %cst_56 {dimension_numbers = #tpu.dot_dimension_numbers<[1], [0], [0], [1], [0, 0, 1, 1], [], []>} : vector<8x128xbf16>, vector<128x64xbf16>, vector<8x64xf32> -> vector<8x64xf32>
    %73 = arith.addf %67, %72 : vector<8x64xf32>
    %c6 = arith.constant 6 : index
    %c0_57 = arith.constant 0 : index
    %74 = vector.load %arg6[%c6, %c0_57] : memref<14x128xf32, #tpu.memory_space<vmem>>, vector<8x128xf32>
    %75 = arith.truncf %74 : vector<8x128xf32> to vector<8x128xbf16>
    %c6_58 = arith.constant 6 : index
    %c0_59 = arith.constant 0 : index
    %c0_60 = arith.constant 0 : index
    %76 = vector.load %arg4[%c6_58, %c0_59, %c0_60] : memref<7x128x64xbf16, #tpu.memory_space<vmem>>, vector<1x128x64xbf16>
    %77 = vector.shape_cast %76 : vector<1x128x64xbf16> to vector<128x64xbf16>
    %cst_61 = arith.constant dense<0.000000e+00> : vector<8x64xf32>
    %78 = tpu.matmul %75, %77, %cst_61 {dimension_numbers = #tpu.dot_dimension_numbers<[1], [0], [0], [1], [0, 0, 1, 1], [], []>} : vector<8x128xbf16>, vector<128x64xbf16>, vector<8x64xf32> -> vector<8x64xf32>
    %79 = arith.addf %73, %78 : vector<8x64xf32>
    %80 = arith.negf %79 : vector<8x64xf32>
    %81 = math.exp %80 : vector<8x64xf32>
    %cst_62 = arith.constant 1.000000e+00 : f32
    %82 = vector.broadcast %cst_62 : f32 to vector<8x64xf32>
    %83 = arith.addf %82, %81 : vector<8x64xf32>
    %84 = arith.divf %82, %83 : vector<8x64xf32>
    %85 = vector.shape_cast %84 : vector<8x64xf32> to vector<1x8x64xf32>
    %86 = vector.broadcast %85 : vector<1x8x64xf32> to vector<32x8x64xf32>
    %87 = arith.mulf %29, %86 : vector<32x8x64xf32>
    %c0_63 = arith.constant 0 : index
    %c0_64 = arith.constant 0 : index
    %c0_65 = arith.constant 0 : index
    %c0_66 = arith.constant 0 : index
    %88 = vector.load %arg5[%c0_63, %c0_64, %c0_65, %c0_66] : memref<1x32x8x64xf32, #tpu.memory_space<vmem>>, vector<1x32x8x64xf32>
    %89 = vector.shape_cast %88 : vector<1x32x8x64xf32> to vector<32x8x64xf32>
    %90 = vector.shape_cast %87 : vector<32x8x64xf32> to vector<1x32x8x64xf32>
    tpu.vector_store %arg5[%c0_63, %c0_64, %c0_65, %c0_66], %90 {strides = array<i32>} : memref<1x32x8x64xf32, #tpu.memory_space<vmem>>, vector<1x32x8x64xf32>,
    return
  }
  func.func @transform_0(%arg0: i32) -> (i32, i32, i32, i32) {
    %c0_i32 = arith.constant 0 : i32
    %c0_i32_0 = arith.constant 0 : i32
    %c0_i32_1 = arith.constant 0 : i32
    %c0_i32_2 = arith.constant 0 : i32
    return %arg0, %c0_i32, %c0_i32_0, %c0_i32_1 : i32, i32, i32, i32
  }
  func.func @transform_1(%arg0: i32) -> (i32, i32) {
    %c0_i32 = arith.constant 0 : i32
    %c0_i32_0 = arith.constant 0 : i32
    %c0_i32_1 = arith.constant 0 : i32
    return %c0_i32, %c0_i32_0 : i32, i32
  }
  func.func @transform_2(%arg0: i32) -> (i32, i32) {
    %c0_i32 = arith.constant 0 : i32
    %c0_i32_0 = arith.constant 0 : i32
    %c0_i32_1 = arith.constant 0 : i32
    return %c0_i32, %c0_i32_0 : i32, i32
  }
  func.func @transform_3(%arg0: i32) -> (i32, i32, i32) {
    %c0_i32 = arith.constant 0 : i32
    %c0_i32_0 = arith.constant 0 : i32
    %c0_i32_1 = arith.constant 0 : i32
    %c0_i32_2 = arith.constant 0 : i32
    return %c0_i32, %c0_i32_0, %c0_i32_1 : i32, i32, i32
  }
  func.func @transform_4(%arg0: i32) -> (i32, i32, i32, i32) {
    %c0_i32 = arith.constant 0 : i32
    %c0_i32_0 = arith.constant 0 : i32
    %c0_i32_1 = arith.constant 0 : i32
    %c0_i32_2 = arith.constant 0 : i32
    return %arg0, %c0_i32, %c0_i32_0, %c0_i32_1 : i32, i32, i32, i32
  }
}

</mosaic_0001>

<bundles_post_ra>
// kernel: cbam.1
= control target key start
LH: loop header
LB: loop body
LE: loop exit
PB: predicated region body
PF: predicated region fallthrough
CT: control target
= control target key end

     0   :  { %s3214_s15 = smov 0   ;;  %s4300_s0 = inlined_call_operand.vmem [shape: f32[2,32,8,64], index: 0, kind: input, shape index: {}]   ;;  %s4301_s1 = inlined_call_operand.vmem [shape: f32[2,32], index: 1, kind: input, shape index: {}]   ;;  %s4302_s2 = inlined_call_operand.vmem [shape: f32[32,2], index: 2, kind: input, shape index: {}]   ;;  %s4303_s3 = inlined_call_operand.vmem [shape: bf16[7,128,64], index: 3, kind: input, shape index: {}]   ;;  %s4304_s4 = inlined_call_operand.vmem [shape: f32[2,32,8,64], index: 4, kind: output, shape index: {}]  }
   0x1 LB: > { %s2614_s16 = sadd.s32 4294967295, %s3180_s15   ;;  %p2618_p0 = scmp.ge.s32.totalorder %s3180_s15, 1  ;;  %s3180_s15 = sphi %s3214_s15, %s14_s15  }
   0x2   : > { %p162_p1 = scmp.lt.s32.totalorder %s3180_s15, 3 }
   0x4   : > { %p163_p2 = pnand %p2618_p0, %p162_p1 }
   0x5   : > { %p188_p3 = scmp.lt.s32.totalorder (!%p163_p2), %s2614_s16, 1  ;;  %vm231_vm0 = vcmask (!%p163_p2), 523264   ;;  %vm523_vm1 = vcmask (!%p163_p2), 1041409   ;;  %vm525_vm2 = vcmask (!%p163_p2), 1042434   ;;  %vm527_vm3 = vcmask (!%p163_p2), 1043459   ;;  %s3185_s5 = smov (!%p163_p2), 127  }
   0x6   : > { %166 = sbr.rel (%p163_p2) target bundleno = 1693 (0x69d), region = 36  ;;  %vm529_vm4 = vcmask (!%p163_p2), 1044484   ;;  %vm531_vm5 = vcmask (!%p163_p2), 1045509   ;;  %vm533_vm6 = vcmask (!%p163_p2), 1046534   ;;  %vm535_vm7 = vcmask (!%p163_p2), 1047559  }
   0x7   : > { %vm562_vm8 = vcmask (!%p163_p2), 64512   ;;  %vm3183_vm9 = vmmov (!%p163_p2), 0   ;;  %vm880_vm10 = vcmask (!%p163_p2), 7168   ;;  %vm886_vm11 = vcmask (!%p163_p2), 261120  }
   0x8   : > { %vm965_vm12 = vcmask (!%p163_p2), 15360   ;;  %vm978_vm13 = vcmask (!%p163_p2), 1041408   ;;  %vm1734_vm14 = vcmask (!%p163_p2), 1048064  }
   0xd   : > { %s4306_s16 = smov (!%p188_p3, %s2614_s16), 1 }
   0xe   : > { %s2788_s17 = sshll.u32 %s4306_s16, 8 }
   0xf   : > { %s3230_s20 = scalar_lea.vmem %s4300_s0, %s2788_s17  ;;  %s4199_s7 = scalar_lea.vmem %s4304_s4, %s2788_s17 }
  0x10   : > { %v207_v0 = vld [vmem:[%s3230_s20 + $0x40] sm:$0xff]  ;;  %v208_v2 = vld [vmem:[%s3230_s20 + $0x48] sm:$0xff]  ;;  %v209_v8 = vld [vmem:[%s3230_s20 + $0x50] sm:$0xff] }
  0x11   : > { %v199_v1 = vld [vmem:[%s3230_s20] sm:$0xff]  ;;  %v256_v3 = vsel %vm231_vm0, %v207_v0, 0.0  ;;  %v200_v5 = vld [vmem:[%s3230_s20 + $0x8] sm:$0xff]  ;;  %v259_v6 = vsel %vm231_vm0, %v208_v2, 0.0  ;;  %v201_v9 = vld [vmem:[%s3230_s20 + $0x10] sm:$0xff]  ;;  %v262_v10 = vsel %vm231_vm0, %v209_v8, 0.0 }
  0x12   : > { %v232_v4 = vsel %vm231_vm0, %v199_v1, 0.0  ;;  %257 = vadd.xlane.f32.xlu1 %v256_v3  ;;  %v235_v7 = vsel %vm231_vm0, %v200_v5, 0.0  ;;  %v238_v11 = vsel %vm231_vm0, %v201_v9, 0.0  ;;  %v3245_v12 = vld [vmem:[%s3230_s20 + $0x58] sm:$0xff]  ;;  %v3255_v16 = vld [vmem:[%s3230_s20 + $0x60] sm:$0xff]  ;;  %v3261_v18 = vld [vmem:[%s3230_s20 + $0x68] sm:$0xff] }
  0x13   : > { %233 = vadd.xlane.f32.xlu0 %v232_v4  ;;  %v3248_v13 = vld [vmem:[%s3230_s20 + $0x18] sm:$0xff]  ;;  %v265_v14 = vsel %vm231_vm0, %v3245_v12, 0.0  ;;  %v3258_v17 = vld [vmem:[%s3230_s20 + $0x20] sm:$0xff]  ;;  %v3264_v19 = vld [vmem:[%s3230_s20 + $0x28] sm:$0xff]  ;;  %v268_v24 = vsel %vm231_vm0, %v3255_v16, 0.0  ;;  %v271_v26 = vsel %vm231_vm0, %v3261_v18, 0.0 }
  0x14   : > { %v241_v15 = vsel %vm231_vm0, %v3248_v13, 0.0  ;;  %v3267_v20 = vld [vmem:[%s3230_s20 + $0x88] sm:$0xff]  ;;  %v3270_v21 = vld [vmem:[%s3230_s20 + $0x80] sm:$0xff]  ;;  %v244_v25 = vsel %vm231_vm0, %v3258_v17, 0.0  ;;  %v247_v27 = vsel %vm231_vm0, %v3264_v19, 0.0  ;;  %v583_v32 = vsel %vm231_vm0, %v200_v5, -inf }
  0x15   : > { %v3273_v22 = vld [vmem:[%s3230_s20 + $0xc8] sm:$0xff]  ;;  %v3276_v23 = vld [vmem:[%s3230_s20 + $0xc0] sm:$0xff]  ;;  %v283_v28 = vsel %vm231_vm0, %v3267_v20, 0.0  ;;  %v280_v29 = vsel %vm231_vm0, %v3270_v21, 0.0  ;;  %v580_v33 = vsel %vm231_vm0, %v199_v1, -inf  ;;  %v607_v34 = vsel %vm231_vm0, %v208_v2, -inf }
  0x16   : > { %260 = vadd.xlane.f32.xlu1 %v259_v6  ;;  %v307_v30 = vsel %vm231_vm0, %v3273_v22, 0.0  ;;  %v304_v31 = vsel %vm231_vm0, %v3276_v23, 0.0  ;;  %v604_v35 = vsel %vm231_vm0, %v207_v0, -inf  ;;  %v3299_v36 = vld [vmem:[%s3230_s20 + $0x70] sm:$0xff]  ;;  %v610_v43 = vsel %vm231_vm0, %v209_v8, -inf  ;;  %v3321_v46 = vld [vmem:[%s3230_s20 + $0x78] sm:$0xff] }
  0x17   : > { %236 = vadd.xlane.f32.xlu0 %v235_v7  ;;  %v3302_v37 = vld [vmem:[%s3230_s20 + $0x30] sm:$0xff]  ;;  %v274_v38 = vsel %vm231_vm0, %v3299_v36, 0.0  ;;  %v586_v45 = vsel %vm231_vm0, %v201_v9, -inf  ;;  %v3324_v47 = vld [vmem:[%s3230_s20 + $0x38] sm:$0xff]  ;;  %v277_v48 = vsel %vm231_vm0, %v3321_v46, 0.0  ;;  %v613_v54 = vsel %vm231_vm0, %v3245_v12, -inf }
  0x18   : > { %v3307_v39 = vld [vmem:[%s3230_s20 + $0xd0] sm:$0xff]  ;;  %v250_v40 = vsel %vm231_vm0, %v3302_v37, 0.0  ;;  %v253_v49 = vsel %vm231_vm0, %v3324_v47, 0.0  ;;  %v3331_v50 = vld [vmem:[%s3230_s20 + $0xd8] sm:$0xff]  ;;  %v589_v55 = vsel %vm231_vm0, %v3248_v13, -inf  ;;  %v227_v56 = vld [vmem:[%s3230_s20 + $0xe0] sm:$0xff] }
  0x19   : > { %v310_v41 = vsel %vm231_vm0, %v3307_v39, 0.0  ;;  %v3314_v42 = vld [vmem:[%s3230_s20 + $0x90] sm:$0xff]  ;;  %v3334_v51 = vld [vmem:[%s3230_s20 + $0x98] sm:$0xff]  ;;  %v313_v52 = vsel %vm231_vm0, %v3331_v50, 0.0  ;;  %v219_v57 = vld [vmem:[%s3230_s20 + $0xa0] sm:$0xff]  ;;  %v316_v58 = vsel %vm231_vm0, %v227_v56, 0.0 }
  0x1a   : > { %263 = vadd.xlane.f32.xlu1 %v262_v10  ;;  %v286_v44 = vsel %vm231_vm0, %v3314_v42, 0.0  ;;  %v289_v53 = vsel %vm231_vm0, %v3334_v51, 0.0  ;;  %v292_v59 = vsel %vm231_vm0, %v219_v57, 0.0  ;;  %v616_v60 = vsel %vm231_vm0, %v3255_v16, -inf  ;;  %v228_v62 = vld [vmem:[%s3230_s20 + $0xe8] sm:$0xff]  ;;  %v229_v8 = vld [vmem:[%s3230_s20 + $0xf0] sm:$0xff] }
  0x1b   : > { %239 = vadd.xlane.f32.xlu0 %v238_v11  ;;  %v592_v61 = vsel %vm231_vm0, %v3258_v17, -inf  ;;  %v220_v63 = vld [vmem:[%s3230_s20 + $0xa8] sm:$0xff]  ;;  %v319_v0 = vsel %vm231_vm0, %v228_v62, 0.0  ;;  %v619_v2 = vsel %vm231_vm0, %v3261_v18, -inf  ;;  %v595_v3 = vsel %vm231_vm0, %v3264_v19, -inf  ;;  %v221_v9 = vld [vmem:[%s3230_s20 + $0xb0] sm:$0xff] }
  0x1c   : > { %v295_v1 = vsel %vm231_vm0, %v220_v63, 0.0  ;;  %v631_v4 = vsel %vm231_vm0, %v3267_v20, -inf  ;;  %v628_v5 = vsel %vm231_vm0, %v3270_v21, -inf  ;;  %v655_v6 = vsel %vm231_vm0, %v3273_v22, -inf  ;;  %v230_v16 = vld [vmem:[%s3230_s20 + $0xf8] sm:$0xff] }
  0x1d   : > { %v652_v7 = vsel %vm231_vm0, %v3276_v23, -inf  ;;  %v322_v10 = vsel %vm231_vm0, %v229_v8, 0.0  ;;  %v298_v11 = vsel %vm231_vm0, %v221_v9, 0.0  ;;  %v622_v12 = vsel %vm231_vm0, %v3299_v36, -inf  ;;  %v222_v17 = vld [vmem:[%s3230_s20 + $0xb8] sm:$0xff] }
  0x1e   : > { %266 = vadd.xlane.f32.xlu1 %v265_v14  ;;  %v598_v13 = vsel %vm231_vm0, %v3302_v37, -inf  ;;  %v658_v14 = vsel %vm231_vm0, %v3307_v39, -inf  ;;  %v325_v18 = vsel %vm231_vm0, %v230_v16, 0.0  ;;  %v301_v19 = vsel %vm231_vm0, %v222_v17, 0.0 }
  0x1f   : > { %242 = vadd.xlane.f32.xlu0 %v241_v15  ;;  %v634_v15 = vsel %vm231_vm0, %v3314_v42, -inf  ;;  %v625_v20 = vsel %vm231_vm0, %v3321_v46, -inf  ;;  %v601_v21 = vsel %vm231_vm0, %v3324_v47, -inf  ;;  %v661_v22 = vsel %vm231_vm0, %v3331_v50, -inf }
  0x20   : > { %v637_v23 = vsel %vm231_vm0, %v3334_v51, -inf  ;;  %v393_v36 = vlaneseq }
  0x22   : > { %269 = vadd.xlane.f32.xlu1 %v268_v24  ;;  %v664_v24 = vsel %vm231_vm0, %v227_v56, -inf  ;;  %v394_v39 = vand.u32 127, %v393_v36 }
  0x23   : > { %245 = vadd.xlane.f32.xlu0 %v244_v25  ;;  %v640_v25 = vsel %vm231_vm0, %v219_v57, -inf }
  0x26   : > { %272 = vadd.xlane.f32.xlu1 %v271_v26  ;;  %v667_v26 = vsel %vm231_vm0, %v228_v62, -inf }
  0x27   : > { %248 = vadd.xlane.f32.xlu0 %v247_v27  ;;  %v643_v27 = vsel %vm231_vm0, %v220_v63, -inf }
  0x2a   : > { %284 = vadd.xlane.f32.xlu1 %v283_v28  ;;  %v670_v28 = vsel %vm231_vm0, %v229_v8, -inf }
  0x2b   : > { %281 = vadd.xlane.f32.xlu0 %v280_v29  ;;  %v646_v29 = vsel %vm231_vm0, %v221_v9, -inf }
  0x2e   : > { %308 = vadd.xlane.f32.xlu1 %v307_v30  ;;  %v673_v30 = vsel %vm231_vm0, %v230_v16, -inf }
  0x2f   : > { %305 = vadd.xlane.f32.xlu0 %v304_v31  ;;  %v649_v31 = vsel %vm231_vm0, %v222_v17, -inf }
  0x32   : > { %584 = vmax.xlane.f32.xlu1 %v583_v32 }
  0x33   : > { %581 = vmax.xlane.f32.xlu0 %v580_v33 }
  0x36   : > { %608 = vmax.xlane.f32.xlu1 %v607_v34 }
  0x37   : > { %605 = vmax.xlane.f32.xlu0 %v604_v35 }
  0x3a   : > { %275 = vadd.xlane.f32.xlu1 %v274_v38 }
  0x3b   : > { %251 = vadd.xlane.f32.xlu0 %v250_v40  ;;  %v3406_v40 = vshrl.u32 %v393_v36, 7 }
  0x3e   : > { %311 = vadd.xlane.f32.xlu1 %v310_v41 }
  0x3f   : > { %287 = vadd.xlane.f32.xlu0 %v286_v44 }
  0x42   : > { %611 = vmax.xlane.f32.xlu1 %v610_v43 }
  0x43   : > { %587 = vmax.xlane.f32.xlu0 %v586_v45  ;;  %v3411_v45 = vsub.s32 %v394_v39, %v3406_v40 }
  0x46   : > { %278 = vadd.xlane.f32.xlu1 %v277_v48 }
  0x47   : > { %254 = vadd.xlane.f32.xlu0 %v253_v49 }
  0x4a   : > { %314 = vadd.xlane.f32.xlu1 %v313_v52 }
  0x4b   : > { %290 = vadd.xlane.f32.xlu0 %v289_v53 }
  0x4e   : > { %614 = vmax.xlane.f32.xlu1 %v613_v54 }
  0x4f   : > { %590 = vmax.xlane.f32.xlu0 %v589_v55 }
  0x52   : > { %317 = vadd.xlane.f32.xlu1 %v316_v58 }
  0x53   : > { %293 = vadd.xlane.f32.xlu0 %v292_v59 }
  0x56   : > { %617 = vmax.xlane.f32.xlu1 %v616_v60 }
  0x57   : > { %593 = vmax.xlane.f32.xlu0 %v592_v61 }
  0x5a   : > { %320 = vadd.xlane.f32.xlu1 %v319_v0 }
  0x5b   : > { %296 = vadd.xlane.f32.xlu0 %v295_v1 }
  0x5e   : > { %620 = vmax.xlane.f32.xlu1 %v619_v2 }
  0x5f   : > { %596 = vmax.xlane.f32.xlu0 %v595_v3 }
  0x62   : > { %632 = vmax.xlane.f32.xlu1 %v631_v4 }
  0x63   : > { %629 = vmax.xlane.f32.xlu0 %v628_v5 }
  0x66   : > { %656 = vmax.xlane.f32.xlu1 %v655_v6 }
  0x67   : > { %653 = vmax.xlane.f32.xlu0 %v652_v7 }
  0x6a   : > { %323 = vadd.xlane.f32.xlu1 %v322_v10 }
  0x6b   : > { %299 = vadd.xlane.f32.xlu0 %v298_v11 }
  0x6e   : > { %623 = vmax.xlane.f32.xlu1 %v622_v12 }
  0x6f   : > { %599 = vmax.xlane.f32.xlu0 %v598_v13 }
  0x72   : > { %659 = vmax.xlane.f32.xlu1 %v658_v14 }
  0x73   : > { %635 = vmax.xlane.f32.xlu0 %v634_v15 }
  0x76   : > { %326 = vadd.xlane.f32.xlu1 %v325_v18 }
  0x77   : > { %302 = vadd.xlane.f32.xlu0 %v301_v19 }
  0x7a   : > { %626 = vmax.xlane.f32.xlu1 %v625_v20 }
  0x7b   : > { %602 = vmax.xlane.f32.xlu0 %v601_v21 }
  0x7e   : > { %662 = vmax.xlane.f32.xlu1 %v661_v22 }
  0x7f   : > { %638 = vmax.xlane.f32.xlu0 %v637_v23 }
  0x82   : > { %665 = vmax.xlane.f32.xlu1 %v664_v24 }
  0x83   : > { %641 = vmax.xlane.f32.xlu0 %v640_v25 }
  0x86   : > { %668 = vmax.xlane.f32.xlu1 %v667_v26 }
  0x87   : > { %644 = vmax.xlane.f32.xlu0 %v643_v27 }
  0x8a   : > { %671 = vmax.xlane.f32.xlu1 %v670_v28 }
  0x8b   : > { %647 = vmax.xlane.f32.xlu0 %v646_v29 }
  0x8e   : > { %674 = vmax.xlane.f32.xlu1 %v673_v30 }
  0x8f   : > { %650 = vmax.xlane.f32.xlu0 %v649_v31 }
  0x9f   : > { %v3400_v32 = vpop.xlane.xlu1 %257 }
  0xa0   : > { %v234_v33 = vpop.xlane.xlu0 %233 }
  0xa1   : > { %v329_v46 = vmul.f32 0.015625, %v234_v33 }
  0xa3   : > { %v3402_v34 = vpop.xlane.xlu1 %260  ;;  %v398_v53 = vrot.slane %v329_v46, %v3411_v45 }
  0xa4   : > { %v237_v35 = vpop.xlane.xlu0 %236 }
  0xa5   : > { %v330_v43 = vmul.f32 0.015625, %v237_v35 }
  0xa7   : > { %v3404_v37 = vpop.xlane.xlu1 %263  ;;  %v402_v50 = vrot.slane %v330_v43, %v3411_v45 }
  0xa8   : > { %v240_v38 = vpop.xlane.xlu0 %239 }
  0xa9   : > { %v331_v44 = vmul.f32 0.015625, %v240_v38  ;;  %v524_v58 = vsel %vm523_vm1, %v402_v50, %v398_v53  ;;  %v339_v50 = vmul.f32 0.015625, %v3404_v37 }
  0xab   : > { %v3408_v41 = vpop.xlane.xlu1 %266  ;;  %v406_v52 = vrot.slane %v331_v44, %v3411_v45 }
  0xac   : > { %v243_v42 = vpop.xlane.xlu0 %242 }
  0xad   : > { %v332_v47 = vmul.f32 0.015625, %v243_v42  ;;  %v526_v60 = vsel %vm525_vm2, %v406_v52, %v524_v58 }
  0xaf   : > { %v3413_v48 = vpop.xlane.xlu1 %269  ;;  %v410_v54 = vrot.slane %v332_v47, %v3411_v45 }
  0xb0   : > { %v246_v49 = vpop.xlane.xlu0 %245  ;;  %v341_v58 = vmul.f32 0.015625, %v3413_v48 }
  0xb1   : > { %v333_v51 = vmul.f32 0.015625, %v246_v49  ;;  %v528_v61 = vsel %vm527_vm3, %v410_v54, %v526_v60  ;;  %v338_v49 = vmul.f32 0.015625, %v3402_v34  ;;  %v340_v54 = vmul.f32 0.015625, %v3408_v41 }
  0xb2   : > { %v446_v48 = vrot.slane %v341_v58, %v3411_v45 }
  0xb3   : > { %v414_v55 = vrot.slane %v333_v51, %v3411_v45  ;;  %v273_v56 = vpop.xlane.xlu1 %272  ;;  %v337_v51 = vmul.f32 0.015625, %v3400_v32 }
  0xb4   : > { %v249_v57 = vpop.xlane.xlu0 %248 }
  0xb5   : > { %v334_v59 = vmul.f32 0.015625, %v249_v57  ;;  %v530_v63 = vsel %vm529_vm4, %v414_v55, %v528_v61  ;;  %v434_v55 = vrot.slane %v338_v49, %v3411_v45  ;;  %v438_v57 = vrot.slane %v339_v50, %v3411_v45 }
  0xb6   : > { %v430_v60 = vrot.slane %v337_v51, %v3411_v45 }
  0xb7   : > { %v418_v62 = vrot.slane %v334_v59, %v3411_v45  ;;  %v285_v0 = vpop.xlane.xlu1 %284  ;;  %v342_v59 = vmul.f32 0.015625, %v273_v56 }
  0xb8   : > { %v282_v1 = vpop.xlane.xlu0 %281  ;;  %v346_v34 = vmul.f32 0.015625, %v285_v0 }
  0xb9   : > { %v532_v2 = vsel %vm531_vm5, %v418_v62, %v530_v63  ;;  %v345_v61 = vmul.f32 0.015625, %v282_v1  ;;  %v442_v62 = vrot.slane %v340_v54, %v3411_v45  ;;  %v537_v63 = vsel %vm523_vm1, %v434_v55, %v430_v60 }
  0xba   : > { %v450_v56 = vrot.slane %v342_v59, %v3411_v45  ;;  %v466_v0 = vrot.slane %v346_v34, %v3411_v45 }
  0xbb   : > { %v309_v3 = vpop.xlane.xlu1 %308  ;;  %v462_v1 = vrot.slane %v345_v61, %v3411_v45 }
  0xbc   : > { %v306_v4 = vpop.xlane.xlu0 %305  ;;  %v354_v5 = vmul.f32 0.015625, %v309_v3 }
  0xbd   : > { %v353_v6 = vmul.f32 0.015625, %v306_v4  ;;  %v538_v4 = vsel %vm525_vm2, %v438_v57, %v537_v63 }
  0xbe   : > { %v498_v7 = vrot.slane %v354_v5, %v3411_v45 }
  0xbf   : > { %v494_v8 = vrot.slane %v353_v6, %v3411_v45  ;;  %v585_v9 = vpop.xlane.xlu1 %584 }
  0xc0   : > { %v582_v10 = vpop.xlane.xlu0 %581  ;;  %v715_v12 = vrot.slane %v585_v9, %v3411_v45  ;;  %v539_v9 = vsel %vm527_vm3, %v442_v62, %v538_v4 }
  0xc1   : > { %v3429_v11 = vsel %vm523_vm1, %v498_v7, %v494_v8  ;;  %v711_v13 = vrot.slane %v582_v10, %v3411_v45 }
  0xc3   : > { %v3434_v14 = vsel %vm523_vm1, %v715_v12, %v711_v13  ;;  %v3436_v15 = vpop.xlane.xlu1 %608 }
  0xc4   : > { %v3438_v16 = vpop.xlane.xlu0 %605  ;;  %v747_v10 = vrot.slane %v3436_v15, %v3411_v45  ;;  %v544_v15 = vsel %vm523_vm1, %v466_v0, %v462_v1 }
  0xc5   : > { %v743_v13 = vrot.slane %v3438_v16, %v3411_v45 }
  0xc7   : > { %v276_v17 = vpop.xlane.xlu1 %275  ;;  %v843_v54 = vsel %vm523_vm1, %v747_v10, %v743_v13 }
  0xc8   : > { %v252_v18 = vpop.xlane.xlu0 %251  ;;  %v343_v41 = vmul.f32 0.015625, %v276_v17 }
  0xc9   : > { %v335_v19 = vmul.f32 0.015625, %v252_v18 }
  0xca   : > { %v454_v17 = vrot.slane %v343_v41, %v3411_v45 }
  0xcb   : > { %v422_v20 = vrot.slane %v335_v19, %v3411_v45  ;;  %v312_v21 = vpop.xlane.xlu1 %311 }
  0xcc   : > { %v288_v22 = vpop.xlane.xlu0 %287 }
  0xcd   : > { %v3442_v23 = vsel %vm533_vm6, %v422_v20, %v532_v2  ;;  %v355_v2 = vmul.f32 0.015625, %v312_v21  ;;  %v347_v3 = vmul.f32 0.015625, %v288_v22  ;;  %v540_v22 = vsel %vm529_vm4, %v446_v48, %v539_v9 }
  0xce   : > { %v541_v49 = vsel %vm531_vm5, %v450_v56, %v540_v22 }
  0xcf   : > { %v3444_v24 = vpop.xlane.xlu1 %611  ;;  %v502_v18 = vrot.slane %v355_v2, %v3411_v45  ;;  %v470_v19 = vrot.slane %v347_v3, %v3411_v45  ;;  %v542_v58 = vsel %vm533_vm6, %v454_v17, %v541_v49 }
  0xd0   : > { %v3446_v25 = vpop.xlane.xlu0 %587  ;;  %v751_v20 = vrot.slane %v3444_v24, %v3411_v45 }
  0xd1   : > { %v719_v21 = vrot.slane %v3446_v25, %v3411_v45  ;;  %v552_v55 = vsel %vm525_vm2, %v502_v18, %v3429_v11  ;;  %v545_v57 = vsel %vm525_vm2, %v470_v19, %v544_v15 }
  0xd2   : > { %v844_v59 = vsel %vm525_vm2, %v751_v20, %v843_v54 }
  0xd3   : > { %v279_v26 = vpop.xlane.xlu1 %278 }
  0xd4   : > { %v255_v27 = vpop.xlane.xlu0 %254  ;;  %v344_v5 = vmul.f32 0.015625, %v279_v26 }
  0xd5   : > { %v336_v6 = vmul.f32 0.015625, %v255_v27 }
  0xd6   : > { %v458_v26 = vrot.slane %v344_v5, %v3411_v45 }
  0xd7   : > { %v315_v28 = vpop.xlane.xlu1 %314  ;;  %v426_v16 = vrot.slane %v336_v6, %v3411_v45 }
  0xd8   : > { %v291_v29 = vpop.xlane.xlu0 %290  ;;  %v356_v12 = vmul.f32 0.015625, %v315_v28  ;;  %v543_v62 = vsel %vm535_vm7, %v458_v26, %v542_v58 }
  0xd9   : > { %v348_v50 = vmul.f32 0.015625, %v291_v29  ;;  %v837_v29 = vsel %vm525_vm2, %v719_v21, %v3434_v14  ;;  %v536_v14 = vsel %vm535_vm7, %v426_v16, %v3442_v23 }
  0xda   : > { %v506_v24 = vrot.slane %v356_v12, %v3411_v45 }
  0xdb   : > { %v3448_v30 = vpop.xlane.xlu1 %614 }
  0xdc   : > { %v3450_v31 = vpop.xlane.xlu0 %590  ;;  %v755_v25 = vrot.slane %v3448_v30, %v3411_v45  ;;  %v553_v63 = vsel %vm527_vm3, %v506_v24, %v552_v55 }
  0xdd   : > { %v723_v51 = vrot.slane %v3450_v31, %v3411_v45 }
  0xdf   : > { %v3452_v33 = vpop.xlane.xlu1 %317  ;;  %v838_v41 = vsel %vm527_vm3, %v723_v51, %v837_v29 }
  0xe0   : > { %v3454_v35 = vpop.xlane.xlu0 %293 }
  0xe1   : > { %v349_v2 = vmul.f32 0.015625, %v3454_v35 }
  0xe3   : > { %v3456_v36 = vpop.xlane.xlu1 %617 }
  0xe4   : > { %v3458_v38 = vpop.xlane.xlu0 %593  ;;  %v759_v30 = vrot.slane %v3456_v36, %v3411_v45  ;;  %v474_v36 = vrot.slane %v348_v50, %v3411_v45 }
  0xe5   : > { %v727_v31 = vrot.slane %v3458_v38, %v3411_v45  ;;  %v845_v38 = vsel %vm527_vm3, %v755_v25, %v844_v59  ;;  %v566_v59 = vsel %vm562_vm8, %v543_v62, 0.0 }
  0xe6   : > { %v846_v23 = vsel %vm529_vm4, %v759_v30, %v845_v38  ;;  %v546_v16 = vsel %vm527_vm3, %v474_v36, %v545_v57  ;;  %v563_v57 = vsel %vm562_vm8, %v536_v14, 0.0 }
  0xe7   : > { %v3460_v39 = vpop.xlane.xlu1 %320  ;;  %v839_v4 = vsel %vm529_vm4, %v727_v31, %v838_v41 }
  0xe8   : > { %v3462_v42 = vpop.xlane.xlu0 %296  ;;  %v358_v48 = vmul.f32 0.015625, %v3460_v39 }
  0xe9   : > { %v350_v56 = vmul.f32 0.015625, %v3462_v42  ;;  %v478_v42 = vrot.slane %v349_v2, %v3411_v45 }
  0xeb   : > { %v3464_v43 = vpop.xlane.xlu1 %620  ;;  %v547_v25 = vsel %vm529_vm4, %v478_v42, %v546_v16 }
  0xec   : > { %v3466_v44 = vpop.xlane.xlu0 %596  ;;  %v763_v60 = vrot.slane %v3464_v43, %v3411_v45  ;;  %v357_v43 = vmul.f32 0.015625, %v3452_v33 }
  0xed   : > { %v731_v11 = vrot.slane %v3466_v44, %v3411_v45 }
  0xee   : > { %v847_v0 = vsel %vm531_vm5, %v763_v60, %v846_v23  ;;  %v510_v39 = vrot.slane %v357_v43, %v3411_v45 }
  0xef   : > { %v3468_v46 = vpop.xlane.xlu1 %632  ;;  %v840_v33 = vsel %vm531_vm5, %v731_v11, %v839_v4 }
  0xf0   : > { %v3470_v47 = vpop.xlane.xlu0 %629  ;;  %v554_v50 = vsel %vm529_vm4, %v510_v39, %v553_v63  ;;  %v779_v11 = vrot.slane %v3468_v46, %v3411_v45 }
  0xf1   : > { %v775_v14 = vrot.slane %v3470_v47, %v3411_v45 }
  0xf3   : > { %v3475_v52 = vpop.xlane.xlu1 %656 }
  0xf4   : > { %v3477_v53 = vpop.xlane.xlu0 %653  ;;  %v811_v36 = vrot.slane %v3475_v52, %v3411_v45 }
  0xf5   : > { %v807_v38 = vrot.slane %v3477_v53, %v3411_v45  ;;  %v850_v53 = vsel %vm523_vm1, %v779_v11, %v775_v14 }
  0xf7   : > { %v3484_v37 = vpop.xlane.xlu1 %323  ;;  %v857_v23 = vsel %vm523_vm1, %v811_v36, %v807_v38 }
  0xf8   : > { %v3486_v32 = vpop.xlane.xlu0 %299  ;;  %v359_v35 = vmul.f32 0.015625, %v3484_v37  ;;  %v514_v37 = vrot.slane %v358_v48, %v3411_v45 }
  0xf9   : > { %v351_v1 = vmul.f32 0.015625, %v3486_v32  ;;  %v482_v32 = vrot.slane %v350_v56, %v3411_v45 }
  0xfa   : > { %v518_v19 = vrot.slane %v359_v35, %v3411_v45  ;;  %v555_v51 = vsel %vm531_vm5, %v514_v37, %v554_v50 }
  0xfb   : > { %v3495_v7 = vpop.xlane.xlu1 %623  ;;  %v486_v20 = vrot.slane %v351_v1, %v3411_v45  ;;  %v548_v54 = vsel %vm531_vm5, %v482_v32, %v547_v25 }
  0xfc   : > { %v3497_v8 = vpop.xlane.xlu0 %599  ;;  %v767_v44 = vrot.slane %v3495_v7, %v3411_v45  ;;  %v556_v29 = vsel %vm533_vm6, %v518_v19, %v555_v51  ;;  %v3184_v19 = vmov 0.0  }
  0xfd   : > { %v735_v3 = vrot.slane %v3497_v8, %v3411_v45  ;;  %v549_v30 = vsel %vm533_vm6, %v486_v20, %v548_v54  ;;  %2871 = vmatprep.mubr.msk.f32.mxu0 %vm3183_vm9, %v3184_v19  ;;  %1727 = vst [vmem:[#allocation2] sm:$0x7] %v3184_v19  ;;  %1728 = vst [vmem:[#allocation2 + $0xb] sm:$0x7] %v3184_v19  ;;  %2942 = vmatprep.subr.bf16.mxu1 %v3184_v19 }
  0xfe   : > { %v848_v12 = vsel %vm533_vm6, %v767_v44, %v847_v0  ;;  %2958 = vmatprep.mubr.msk.bf16.mxu1 %vm3183_vm9, %v3184_v19 }
  0xff   : > { %v3515_v27 = vpop.xlane.xlu1 %659  ;;  %v841_v13 = vsel %vm533_vm6, %v735_v3, %v840_v33 }
 0x100   : > { %v3517_v28 = vpop.xlane.xlu0 %635  ;;  %v815_v46 = vrot.slane %v3515_v27, %v3411_v45 }
 0x101   : > { %v783_v41 = vrot.slane %v3517_v28, %v3411_v45 }
 0x102   : > { %v858_v28 = vsel %vm525_vm2, %v815_v46, %v857_v23 }
 0x103   : > { %v327_v34 = vpop.xlane.xlu1 %326  ;;  %v851_v48 = vsel %vm525_vm2, %v783_v41, %v850_v53  ;;  %v3186_v41 = vmov 0  }
 0x104   : > { %v303_v61 = vpop.xlane.xlu0 %302  ;;  %v360_v7 = vmul.f32 0.015625, %v327_v34  ;;  %3064 = vset.pattern.permute.xlu1 %v3186_v41  ;;  %3065 = vset.pattern.permute.xlu0 %v3186_v41 }
 0x105   : > { %v352_v8 = vmul.f32 0.015625, %v303_v61 }
 0x106   : > { %v522_v49 = vrot.slane %v360_v7, %v3411_v45 }
 0x107   : > { %v627_v5 = vpop.xlane.xlu1 %626  ;;  %v490_v24 = vrot.slane %v352_v8, %v3411_v45 }
 0x108   : > { %v603_v6 = vpop.xlane.xlu0 %602  ;;  %v771_v9 = vrot.slane %v627_v5, %v3411_v45  ;;  %v557_v31 = vsel %vm535_vm7, %v522_v49, %v556_v29 }
 0x109   : > { %v739_v10 = vrot.slane %v603_v6, %v3411_v45  ;;  %v550_v60 = vsel %vm535_vm7, %v490_v24, %v549_v30  ;;  %v572_v63 = vsel %vm562_vm8, %v557_v31, 0.0  ;;  %v885_v30 = vld [vmem:[%s4301_s1] sm:$0x3] }
 0x10a   : > { %v849_v17 = vsel %vm535_vm7, %v771_v9, %v848_v12  ;;  %v569_v62 = vsel %vm562_vm8, %v550_v60, 0.0  ;;  %v961_v31 = vld [vmem:[%s4302_s2] sm:$0xff] }
 0x10b   : > { %v842_v18 = vsel %vm535_vm7, %v739_v10, %v841_v13  ;;  %v663_v21 = vpop.xlane.xlu1 %662  ;;  %v871_v15 = vsel %vm562_vm8, %v849_v17, -inf }
 0x10c   : > { %v639_v22 = vpop.xlane.xlu0 %638  ;;  %v868_v26 = vsel %vm562_vm8, %v842_v18, -inf  ;;  %872 = vmax.xlane.f32.xlu1 %v871_v15  ;;  %v819_v43 = vrot.slane %v663_v21, %v3411_v45  ;;  %v3182_v18 = vmov 0.0|0.0  }
 0x10d   : > { %869 = vmax.xlane.f32.xlu0 %v868_v26  ;;  %v787_v2 = vrot.slane %v639_v22, %v3411_v45  ;;  %3022 = vmatprep.subr.bf16.mxu0 %v3182_v18 }
 0x10e   : > { %v859_v33 = vsel %vm527_vm3, %v819_v43, %v858_v28 }
 0x10f   : > { %v666_v55 = vpop.xlane.xlu1 %665  ;;  %v852_v35 = vsel %vm527_vm3, %v787_v2, %v851_v48 }
 0x110   : > { %v642_v58 = vpop.xlane.xlu0 %641  ;;  %567 = vadd.xlane.f32.xlu1 %v566_v59  ;;  %v823_v47 = vrot.slane %v666_v55, %v3411_v45 }
 0x111   : > { %564 = vadd.xlane.f32.xlu0 %v563_v57  ;;  %v791_v44 = vrot.slane %v642_v58, %v3411_v45 }
 0x112   : > { %v860_v1 = vsel %vm529_vm4, %v823_v47, %v859_v33  ;;  %v3187_v33 = vmov 1966171168  }
 0x113   : > { %v669_v34 = vpop.xlane.xlu1 %668  ;;  %v853_v5 = vsel %vm529_vm4, %v791_v44, %v852_v35  ;;  %v1117_v35 = vunpack.c.l.s4 %v3187_v33 }
 0x114   : > { %v645_v61 = vpop.xlane.xlu0 %644  ;;  %573 = vadd.xlane.f32.xlu1 %v572_v63  ;;  %v827_v4 = vrot.slane %v669_v34, %v3411_v45  ;;  %v963_v63 = vld [vmem:[%s4302_s2 + $0x10] sm:$0xff] }
 0x115   : > { %570 = vadd.xlane.f32.xlu0 %v569_v62  ;;  %v795_v27 = vrot.slane %v645_v61, %v3411_v45  ;;  %v962_v61 = vld [vmem:[%s4302_s2 + $0x8] sm:$0xff]  ;;  %v964_v62 = vld [vmem:[%s4302_s2 + $0x18] sm:$0xff] }
 0x116   : > { %v861_v8 = vsel %vm531_vm5, %v827_v4, %v860_v1 }
 0x117   : > { %v672_v52 = vpop.xlane.xlu1 %671  ;;  %v854_v9 = vsel %vm531_vm5, %v795_v27, %v853_v5  ;;  %v1118_v5 = vunpack.c.0.s8 %v1117_v35 }
 0x118   : > { %v648_v3 = vpop.xlane.xlu0 %647  ;;  %v831_v56 = vrot.slane %v672_v52, %v3411_v45 }
 0x119   : > { %v799_v0 = vrot.slane %v648_v3, %v3411_v45 }
 0x11a   : > { %v862_v42 = vsel %vm533_vm6, %v831_v56, %v861_v8 }
 0x11b   : > { %v675_v6 = vpop.xlane.xlu1 %674  ;;  %v855_v12 = vsel %vm533_vm6, %v799_v0, %v854_v9 }
 0x11c   : > { %v651_v7 = vpop.xlane.xlu0 %650  ;;  %v835_v10 = vrot.slane %v675_v6, %v3411_v45 }
 0x11d   : > { %v803_v39 = vrot.slane %v651_v7, %v3411_v45  ;;  %v3655_v7 = vsub.s32 %v1118_v5, %v3406_v40 }
 0x11e   : > { %v863_v13 = vsel %vm535_vm7, %v835_v10, %v862_v42 }
 0x11f   : > { %v856_v37 = vsel %vm535_vm7, %v803_v39, %v855_v12  ;;  %v877_v32 = vsel %vm562_vm8, %v863_v13, -inf  ;;  %v3659_v39 = vsub.s32 0, %v3406_v40 }
 0x120   : > { %v874_v17 = vsel %vm562_vm8, %v856_v37, -inf  ;;  %878 = vmax.xlane.f32.xlu1 %v877_v32 }
 0x121   : > { %875 = vmax.xlane.f32.xlu0 %v874_v17 }
 0x199   : > { %v873_v45 = vpop.xlane.xlu1 %872 }
 0x19a   : > { %v870_v20 = vpop.xlane.xlu0 %869 }
 0x19d   : > { %v568_v21 = vpop.xlane.xlu1 %567 }
 0x19e   : > { %v565_v22 = vpop.xlane.xlu0 %564  ;;  %v577_v15 = vmul.f32 0.125, %v568_v21 }
 0x19f   : > { %v576_v26 = vmul.f32 0.125, %v565_v22 }
 0x1a0   : > { %v882_v49 = vsel %vm880_vm10, %v577_v15, %v873_v45 }
 0x1a1   : > { %v881_v16 = vsel %vm880_vm10, %v576_v26, %v870_v20  ;;  %v574_v50 = vpop.xlane.xlu1 %573 }
 0x1a2   : > { %v3023_v24 = vpack.c.bf16 %v882_v49, %v881_v16  ;;  %v571_v25 = vpop.xlane.xlu0 %570  ;;  %v579_v51 = vmul.f32 0.125, %v574_v50 }
 0x1a3   : > { %v578_v54 = vmul.f32 0.125, %v571_v25 }
 0x1a4   : > { %3024 = vmatpush3.bf16.msra.mxu0 %v3023_v24 }
 0x1a5   : > { %3025 = vmatprep.subr.bf16.mxu0 %v3182_v18 }
 0x1ad   : > { %v879_v55 = vpop.xlane.xlu1 %878 }
 0x1ae   : > { %v876_v58 = vpop.xlane.xlu0 %875  ;;  %v884_v59 = vsel %vm880_vm10, %v579_v51, %v879_v55 }
 0x1af   : > { %v883_v57 = vsel %vm880_vm10, %v578_v54, %v876_v58 }
 0x1b0   : > { %v3026_v29 = vpack.c.bf16 %v884_v59, %v883_v57 }
 0x1b2   : > { %3027 = vmatpush3.bf16.msra.mxu0 %v3026_v29 }
 0x1b5   : > { %2872 = vmatmul.mubr.msk.f32.vlgmr.msra.gmra.mrb[0].mxu0 %vm886_vm11, %v885_v30 }
 0x1b6   : > { %2876 = vmatprep.mubr.msk.f32.mxu0 %vm965_vm12, %v961_v31 }
 0x288   : > { %v956_v60 = vpop.f32.mrb[0].mxu0 }
 0x289   : > { %v960_v11 = vmax.f32 %v956_v60, 0.0  ;;  %v2873_v34 = vpop.f32.mrb[1].mxu0 }
 0x28b   : > { %2874 = vmatprep.subr.msk.mxu0 %vm978_vm13, %v960_v11 }
 0x28c   : > { %2875 = vmatpush3.msk.msra.mxu0 %vm978_vm13, %v960_v11 }
 0x28d   : > { %2877 = vmatmul.mubr.msk.f32.vlgmr.msra.gmra.mrb[2].mxu0 %vm965_vm12, %v962_v61  ;;  %2882 = vmatprep.subr.bf16.mxu0 %v3184_v19 }
 0x28e   : > { %2879 = vmatprep.mubr.msk.f32.mxu0 %vm965_vm12, %v963_v63 }
 0x291   : > { %2880 = vmatmul.mubr.msk.f32.gmra.mrb[4].mxu0 %vm965_vm12, %v964_v62 }
 0x292   : > { %2898 = vmatprep.mubr.msk.bf16.mxu0 %vm3183_vm9, %v3184_v19 }
 0x360   : > { %v2878_v14 = vpop.f32.mrb[2].mxu0 }
 0x361   : > { %1073 = vrot.lane.b32.xlu1 %v2878_v14, %s3185_s5  ;;  %v1048_v36 = vpop.f32.mrb[3].mxu0 }
 0x362   : > { %1071 = vrot.lane.b32.xlu0 %v1048_v36, %s3185_s5 }
 0x364   : > { %v2881_v38 = vpop.f32.mrb[4].mxu0 }
 0x365   : > { %v1058_v46 = vpop.f32.mrb[5].mxu0 }
 0x366   : > { %1075 = vrot.lane.b32.xlu1 %v1058_v46, %s3185_s5 }
 0x36a   : > { %1077 = vrot.lane.b32.xlu1 %v2881_v38, %s3185_s5 }
 0x3d3   : > { %v1074_v43 = vpop.permute.xlu1 %1073 }
 0x3d4   : > { %v1084_v2 = vadd.f32 %v2878_v14, %v1074_v43  ;;  %v1072_v47 = vpop.permute.xlu0 %1071 }
 0x3d5   : > { %v1083_v44 = vadd.f32 %v1072_v47, %v1048_v36 }
 0x3d6   : > { %v2630_v52 = vmul.f32 -1.442695, %v1084_v2 }
 0x3d7   : > { %v2629_v3 = vmul.f32 -1.442695, %v1083_v44 }
 0x3d8   : > { %3122 = vpow2.f32 %v2630_v52  ;;  %v1076_v53 = vpop.permute.xlu1 %1075 }
 0x3d9   : > { %3124 = vpow2.f32 %v2629_v3  ;;  %v1085_v1 = vadd.f32 %v1076_v53, %v1058_v46 }
 0x3db   : > { %v2631_v6 = vmul.f32 -1.442695, %v1085_v1 }
 0x3dc   : > { %v1078_v23 = vpop.permute.xlu1 %1077 }
 0x3dd   : > { %v1086_v4 = vadd.f32 %v2881_v38, %v1078_v23 }
 0x3df   : > { %v2632_v56 = vmul.f32 -1.442695, %v1086_v4 }
 0x3e2   : > { %v3123_v27 = vpop.eup %3122 }
 0x3e3   : > { %v3125_v28 = vpop.eup %3124  ;;  %v1100_v48 = vadd.f32 1.0, %v3123_v27 }
 0x3e4   : > { %v1099_v0 = vadd.f32 1.0, %v3125_v28 }
 0x3e5   : > { %3126 = vrcp.f32 %v1100_v48 }
 0x3e6   : > { %3128 = vrcp.f32 %v1099_v0 }
 0x3e7   : > { %3130 = vpow2.f32 %v2632_v56 }
 0x3e8   : > { %3132 = vpow2.f32 %v2631_v6 }
 0x3ef   : > { %v3127_v8 = vpop.eup %3126 }
 0x3f0   : > { %v3129_v9 = vpop.eup %3128  ;;  %v1171_v10 = vrot.slane %v3127_v8, %v3655_v7  ;;  %v1164_v42 = vcombine.high %v3127_v8, %v3127_v8 }
 0x3f1   : > { %v3131_v12 = vpop.eup %3130  ;;  %v1122_v13 = vrot.slane %v3129_v9, %v3655_v7  ;;  %v1115_v51 = vcombine.high %v3129_v9, %v3129_v9 }
 0x3f2   : > { %v1187_v37 = vrot.slane %v1171_v10, %v3655_v7  ;;  %v1179_v32 = vcombine.high %v1171_v10, %v1171_v10  ;;  %v1102_v18 = vadd.f32 1.0, %v3131_v12  ;;  %v1178_v21 = vrot.slane %v1164_v42, %v3655_v7  ;;  %v3133_v49 = vpop.eup %3132 }
 0x3f3   : > { %v1138_v17 = vrot.slane %v1122_v13, %v3655_v7  ;;  %v1130_v16 = vcombine.high %v1122_v13, %v1122_v13  ;;  %v1101_v54 = vadd.f32 1.0, %v3133_v49  ;;  %v1129_v29 = vrot.slane %v1115_v51, %v3655_v7 }
 0x3f4   : > { %v1346_v45 = vrot.slane %v1187_v37, %v3659_v39  ;;  %v1209_v20 = vcombine.high %v1187_v37, %v1187_v37  ;;  %v1201_v40 = vrot.slane %v1179_v32, %v3655_v7  ;;  %3134 = vrcp.f32 %v1102_v18 }
 0x3f5   : > { %v1314_v22 = vrot.slane %v1138_v17, %v3659_v39  ;;  %v1194_v26 = vrot.slane %v1178_v21, %v3655_v7  ;;  %v1180_v25 = vcombine.high %v1178_v21, %v1178_v21  ;;  %v1152_v58 = vrot.slane %v1130_v16, %v3655_v7 }
 0x3f6   : > { %1472 = vperm.xlu1 %3064, %v1346_v45   ;;  %v1354_v15 = vrot.slane %v1209_v20, %v3659_v39  ;;  %v1350_v24 = vrot.slane %v1201_v40, %v3659_v39  ;;  %v1211_v50 = vcombine.high %v1201_v40, %v1201_v40  ;;  %3136 = vrcp.f32 %v1101_v54 }
 0x3f7   : > { %1440 = vperm.xlu0 %3065, %v1314_v22   ;;  %v1362_v55 = vrot.slane %v1194_v26, %v3659_v39  ;;  %v1208_v57 = vrot.slane %v1180_v25, %v3655_v7  ;;  %v1318_v30 = vrot.slane %v1152_v58, %v3659_v39  ;;  %v1160_v31 = vcombine.high %v1138_v17, %v1138_v17 }
 0x3f8   : > { %v1358_v59 = vrot.slane %v1211_v50, %v3659_v39  ;;  %v1162_v11 = vcombine.high %v1152_v58, %v1152_v58  ;;  %v1131_v34 = vcombine.high %v1129_v29, %v1129_v29  ;;  %v1145_v62 = vrot.slane %v1129_v29, %v3655_v7 }
 0x3f9   : > { %v1366_v60 = vrot.slane %v1208_v57, %v3659_v39  ;;  %v1322_v63 = vrot.slane %v1160_v31, %v3659_v39  ;;  %v1210_v41 = vcombine.high %v1194_v26, %v1194_v26  ;;  %v1212_v2 = vcombine.high %v1208_v57, %v1208_v57  ;;  %v3066_v31 = vld [vmem:[%s4303_s3 + $0x40] sm:$0xff]  }
 0x3fa   : > { %1480 = vperm.xlu1 %3064, %v1354_v15   ;;  %v1326_v14 = vrot.slane %v1162_v11, %v3659_v39  ;;  %v1159_v36 = vrot.slane %v1131_v34, %v3655_v7  ;;  %v1330_v46 = vrot.slane %v1145_v62, %v3659_v39  ;;  %v1161_v28 = vcombine.high %v1145_v62, %v1145_v62  ;;  %v3068_v11 = vld [vmem:[%s4303_s3 + $0x48] sm:$0xff]   ;;  %v3070_v34 = vld [vmem:[%s4303_s3 + $0x50] sm:$0xff]   ;;  %v3073_v62 = vld [vmem:[%s4303_s3 + $0xd8] sm:$0xff]  }
 0x3fb   : > { %1476 = vperm.xlu0 %3065, %v1350_v24   ;;  %v1370_v52 = vrot.slane %v1210_v41, %v3659_v39  ;;  %v1374_v53 = vrot.slane %v1212_v2, %v3659_v39  ;;  %2883 = vmatpush3.bf16.msra.mxu0 %v3066_v31 }
 0x3fc   : > { %v1334_v43 = vrot.slane %v1159_v36, %v3659_v39  ;;  %v1163_v56 = vcombine.high %v1159_v36, %v1159_v36  ;;  %v1338_v35 = vrot.slane %v1161_v28, %v3659_v39  ;;  %2884 = vmatprep.subr.bf16.mxu0 %v3184_v19  ;;  %v3075_v36 = vld [vmem:[%s4303_s3 + $0xe0] sm:$0xff]  }
 0x3fe   : > { %1488 = vperm.xlu1 %3064, %v1362_v55   ;;  %v3135_v61 = vpop.eup %3134  ;;  %v1342_v5 = vrot.slane %v1163_v56, %v3659_v39 }
 0x3ff   : > { %1484 = vperm.xlu0 %3065, %v1358_v59   ;;  %v1269_v38 = vrot.slane %v3135_v61, %v3655_v7  ;;  %v1262_v33 = vcombine.high %v3135_v61, %v3135_v61  ;;  %2885 = vmatpush3.bf16.msra.mxu0 %v3068_v11  ;;  %v3071_v61 = vld [vmem:[%s4303_s3 + $0xd0] sm:$0xff]   ;;  %v3152_v11 = vld [vmem:[%s3230_s20 + $0x48] sm:$0xff] }
 0x400   : > { %v3137_v44 = vpop.eup %3136  ;;  %2886 = vmatprep.subr.bf16.mxu0 %v3184_v19 }
 0x401   : > { %v1277_v47 = vcombine.high %v1269_v38, %v1269_v38  ;;  %v1285_v3 = vrot.slane %v1269_v38, %v3655_v7  ;;  %v1220_v4 = vrot.slane %v3137_v44, %v3655_v7  ;;  %v1276_v8 = vrot.slane %v1262_v33, %v3655_v7  ;;  %v3076_v38 = vld [vmem:[%s4303_s3 + $0x68] sm:$0xff]  }
 0x402   : > { %1444 = vperm.xlu1 %3064, %v1318_v30   ;;  %v1213_v37 = vcombine.high %v3137_v44, %v3137_v44 }
 0x403   : > { %1492 = vperm.xlu0 %3065, %v1366_v60   ;;  %v1299_v23 = vrot.slane %v1277_v47, %v3655_v7  ;;  %v1410_v27 = vrot.slane %v1285_v3, %v3659_v39  ;;  %v1228_v0 = vcombine.high %v1220_v4, %v1220_v4  ;;  %v1236_v1 = vrot.slane %v1220_v4, %v3655_v7  ;;  %v3067_v60 = vld [vmem:[%s4303_s3 + $0xc0] sm:$0xff]  }
 0x404   : > { %v1307_v9 = vcombine.high %v1285_v3, %v1285_v3  ;;  %v1278_v13 = vcombine.high %v1276_v8, %v1276_v8  ;;  %v1292_v17 = vrot.slane %v1276_v8, %v3655_v7  ;;  %v1227_v20 = vrot.slane %v1213_v37, %v3655_v7  ;;  %2943 = vmatpush3.bf16.msra.mxu1 %v3067_v60  ;;  %v3146_v37 = vld [vmem:[%s3230_s20 + $0x20] sm:$0xff] }
 0x405   : > { %v1414_v48 = vrot.slane %v1299_v23, %v3659_v39  ;;  %v1250_v6 = vrot.slane %v1228_v0, %v3655_v7  ;;  %v1378_v10 = vrot.slane %v1236_v1, %v3659_v39  ;;  %v1309_v12 = vcombine.high %v1299_v23, %v1299_v23  ;;  %2944 = vmatprep.subr.bf16.mxu1 %v3184_v19  ;;  %v3144_v0 = vld [vmem:[%s3230_s20 + $0x10] sm:$0xff] }
 0x406   : > { %1448 = vperm.xlu1 %3064, %v1322_v63   ;;  %v1418_v32 = vrot.slane %v1307_v9, %v3659_v39  ;;  %v1306_v45 = vrot.slane %v1278_v13, %v3655_v7  ;;  %v1258_v21 = vcombine.high %v1236_v1, %v1236_v1  ;;  %v1426_v22 = vrot.slane %v1292_v17, %v3659_v39  ;;  %v3072_v63 = vld [vmem:[%s4303_s3 + $0x58] sm:$0xff]  }
 0x407   : > { %1452 = vperm.xlu0 %3065, %v1326_v14   ;;  %v1382_v42 = vrot.slane %v1250_v6, %v3659_v39  ;;  %v1422_v18 = vrot.slane %v1309_v12, %v3659_v39  ;;  %v1260_v40 = vcombine.high %v1250_v6, %v1250_v6  ;;  %v1229_v26 = vcombine.high %v1227_v20, %v1227_v20  ;;  %v3074_v14 = vld [vmem:[%s4303_s3 + $0x60] sm:$0xff]   ;;  %v3145_v6 = vld [vmem:[%s3230_s20 + $0x18] sm:$0xff] }
 0x408   : > { %v1430_v15 = vrot.slane %v1306_v45, %v3659_v39  ;;  %v1386_v16 = vrot.slane %v1258_v21, %v3659_v39  ;;  %v1243_v49 = vrot.slane %v1227_v20, %v3655_v7  ;;  %v1308_v59 = vcombine.high %v1292_v17, %v1292_v17  ;;  %2887 = vmatpush3.bf16.msra.mxu0 %v3070_v34  ;;  %v3147_v21 = vld [vmem:[%s3230_s20 + $0x28] sm:$0xff] }
 0x409   : > { %v1390_v24 = vrot.slane %v1260_v40, %v3659_v39  ;;  %v1257_v50 = vrot.slane %v1229_v26, %v3655_v7  ;;  %v1310_v57 = vcombine.high %v1306_v45, %v1306_v45  ;;  %2888 = vmatprep.subr.bf16.mxu0 %v3184_v19 }
 0x40a   : > { %1456 = vperm.xlu1 %3064, %v1330_v46   ;;  %v1394_v25 = vrot.slane %v1243_v49, %v3659_v39  ;;  %v1259_v51 = vcombine.high %v1243_v49, %v1243_v49  ;;  %v1434_v7 = vrot.slane %v1308_v59, %v3659_v39  ;;  %v3077_v46 = vld [vmem:[%s4303_s3 + $0xe8] sm:$0xff]  }
 0x40b   : > { %1460 = vperm.xlu0 %3065, %v1334_v43   ;;  %v1398_v54 = vrot.slane %v1257_v50, %v3659_v39  ;;  %v1261_v55 = vcombine.high %v1257_v50, %v1257_v50  ;;  %v1438_v30 = vrot.slane %v1310_v57, %v3659_v39 }
 0x40c   : > { %v1402_v58 = vrot.slane %v1259_v51, %v3659_v39  ;;  %2889 = vmatpush3.bf16.msra.mxu0 %v3072_v63 }
 0x40d   : > { %v1406_v29 = vrot.slane %v1261_v55, %v3659_v39  ;;  %v3069_v39 = vld [vmem:[%s4303_s3 + $0xc8] sm:$0xff]   ;;  %2890 = vmatprep.subr.bf16.mxu0 %v3184_v19 }
 0x40e   : > { %1496 = vperm.xlu1 %3064, %v1370_v52   ;;  %2945 = vmatpush3.bf16.msra.mxu1 %v3069_v39 }
 0x40f   : > { %1500 = vperm.xlu0 %3065, %v1374_v53   ;;  %2946 = vmatprep.subr.bf16.mxu1 %v3184_v19  ;;  %v3142_v53 = vld [vmem:[%s3230_s20 + $0x8] sm:$0xff] }
 0x410   : > { %2891 = vmatpush3.bf16.msra.mxu0 %v3074_v14 }
 0x411   : > { %2892 = vmatprep.subr.bf16.mxu0 %v3184_v19 }
 0x412   : > { %1536 = vperm.xlu1 %3064, %v1410_v27   ;;  %2947 = vmatpush3.bf16.msra.mxu1 %v3071_v61  ;;  %v3143_v27 = vld [vmem:[%s3230_s20] sm:$0xff] }
 0x413   : > { %1540 = vperm.xlu0 %3065, %v1414_v48   ;;  %2948 = vmatprep.subr.bf16.mxu1 %v3184_v19  ;;  %v3153_v61 = vld [vmem:[%s3230_s20 + $0x60] sm:$0xff] }
 0x414   : > { %2893 = vmatpush3.bf16.msra.mxu0 %v3076_v38  ;;  %v3154_v38 = vld [vmem:[%s3230_s20 + $0x58] sm:$0xff] }
 0x415   : > { %2894 = vmatprep.subr.bf16.mxu0 %v3184_v19 }
 0x416   : > { %1464 = vperm.xlu1 %3064, %v1338_v35   ;;  %2949 = vmatpush3.bf16.msra.mxu1 %v3073_v62 }
 0x417   : > { %1468 = vperm.xlu0 %3065, %v1342_v5   ;;  %2950 = vmatprep.subr.bf16.mxu1 %v3184_v19 }
 0x41a   : > { %1504 = vperm.xlu1 %3064, %v1378_v10   ;;  %2951 = vmatpush3.bf16.msra.mxu1 %v3075_v36 }
 0x41b   : > { %1508 = vperm.xlu0 %3065, %v1382_v42   ;;  %2952 = vmatprep.subr.bf16.mxu1 %v3184_v19 }
 0x41e   : > { %1544 = vperm.xlu1 %3064, %v1418_v32   ;;  %2953 = vmatpush3.bf16.msra.mxu1 %v3077_v46 }
 0x41f   : > { %1548 = vperm.xlu0 %3065, %v1422_v18   ;;  %2954 = vmatprep.subr.bf16.mxu1 %v3184_v19 }
 0x422   : > { %1552 = vperm.xlu1 %3064, %v1426_v22  }
 0x423   : > { %1556 = vperm.xlu0 %3065, %v1430_v15  }
 0x426   : > { %1512 = vperm.xlu1 %3064, %v1386_v16  }
 0x427   : > { %1516 = vperm.xlu0 %3065, %v1390_v24   ;;  %v3148_v24 = vld [vmem:[%s3230_s20 + $0x30] sm:$0xff] }
 0x42a   : > { %1520 = vperm.xlu1 %3064, %v1394_v25  }
 0x42b   : > { %1524 = vperm.xlu0 %3065, %v1398_v54   ;;  %v3149_v54 = vld [vmem:[%s3230_s20 + $0x38] sm:$0xff] }
 0x42e   : > { %1528 = vperm.xlu1 %3064, %v1402_v58   ;;  %v3150_v58 = vld [vmem:[%s3230_s20 + $0x40] sm:$0xff] }
 0x42f   : > { %1532 = vperm.xlu0 %3065, %v1406_v29   ;;  %v3151_v29 = vld [vmem:[%s3230_s20 + $0x50] sm:$0xff] }
 0x432   : > { %1560 = vperm.xlu1 %3064, %v1434_v7  }
 0x433   : > { %1564 = vperm.xlu0 %3065, %v1438_v30  }
 0x475   : > { %v1473_v41 = vpop.permute.xlu1 %1472 }
 0x476   : > { %v1441_v43 = vpop.permute.xlu0 %1440  ;;  %v3809_v59 = vmul.f32 %v3150_v58, %v1473_v41 }
 0x477   : > { %v3770_v28 = vmul.f32 %v3143_v27, %v1441_v43 }
 0x478   : > { %v1614_v36 = vsel %vm231_vm0, %v3809_v59, 0.0  ;;  %v1676_v43 = vsel %vm231_vm0, %v3809_v59, -inf }
 0x479   : > { %v1481_v2 = vpop.permute.xlu1 %1480  ;;  %v1599_v1 = vsel %vm231_vm0, %v3770_v28, 0.0 }
 0x47a   : > { %v1477_v47 = vpop.permute.xlu0 %1476  ;;  %v3814_v7 = vmul.f32 %v3151_v29, %v1481_v2  ;;  %v1664_v2 = vsel %vm231_vm0, %v3770_v28, -inf  ;;  %v3159_v29 = vld [vmem:[%s3230_s20 + $0x80] sm:$0xff] }
 0x47b   : > { %v3819_v39 = vmul.f32 %v3152_v11, %v1477_v47 }
 0x47c   : > { %v1618_v47 = vsel %vm231_vm0, %v3814_v7, 0.0 }
 0x47d   : > { %v1489_v44 = vpop.permute.xlu1 %1488 }
 0x47e   : > { %v1485_v52 = vpop.permute.xlu0 %1484  ;;  %v3822_v63 = vmul.f32 %v3153_v61, %v1489_v44 }
 0x47f   : > { %v3829_v46 = vmul.f32 %v3154_v38, %v1485_v52  ;;  %v1680_v52 = vsel %vm231_vm0, %v3814_v7, -inf }
 0x481   : > { %v1445_v3 = vpop.permute.xlu1 %1444 }
 0x482   : > { %v3765_v23 = vmul.f32 %v3142_v53, %v1445_v3  ;;  %v3767_v4 = vpop.permute.xlu0 %1492  ;;  %v1616_v53 = vsel %vm231_vm0, %v3819_v39, 0.0 }
 0x484   : > { %v1600_v56 = vsel %vm231_vm0, %v3765_v23, 0.0  ;;  %v1665_v27 = vsel %vm231_vm0, %v3765_v23, -inf }
 0x485   : > { %v1449_v48 = vpop.permute.xlu1 %1448  ;;  %v1601_v9 = vadd.f32 %v1600_v56, %v1599_v1 }
 0x486   : > { %v3775_v33 = vmul.f32 %v3144_v0, %v1449_v48  ;;  %v1453_v35 = vpop.permute.xlu0 %1452  ;;  %v1678_v0 = vsel %vm231_vm0, %v3819_v39, -inf }
 0x487   : > { %v3782_v8 = vmul.f32 %v3145_v6, %v1453_v35  ;;  %v1622_v35 = vsel %vm231_vm0, %v3822_v63, 0.0  ;;  %v1684_v6 = vsel %vm231_vm0, %v3822_v63, -inf }
 0x488   : > { %v1602_v5 = vsel %vm231_vm0, %v3775_v33, 0.0 }
 0x489   : > { %v1457_v10 = vpop.permute.xlu1 %1456  ;;  %v1603_v12 = vadd.f32 %v1602_v5, %v1601_v9  ;;  %v1604_v13 = vsel %vm231_vm0, %v3782_v8, 0.0  ;;  %v1620_v9 = vsel %vm231_vm0, %v3829_v46, 0.0 }
 0x48a   : > { %v1461_v42 = vpop.permute.xlu0 %1460  ;;  %v3787_v32 = vmul.f32 %v3146_v37, %v1457_v10  ;;  %v1682_v10 = vsel %vm231_vm0, %v3829_v46, -inf }
 0x48b   : > { %v1605_v45 = vadd.f32 %v1604_v13, %v1603_v12  ;;  %v3794_v22 = vmul.f32 %v3147_v21, %v1461_v42  ;;  %v3155_v42 = vld [vmem:[%s3230_s20 + $0x68] sm:$0xff]  ;;  %v3156_v13 = vld [vmem:[%s3230_s20 + $0x70] sm:$0xff] }
 0x48c   : > { %v1606_v20 = vsel %vm231_vm0, %v3787_v32, 0.0  ;;  %v1668_v62 = vsel %vm231_vm0, %v3787_v32, -inf  ;;  %v3859_v12 = vmul.f32 %v3155_v42, %v3767_v4  ;;  %v1667_v4 = vsel %vm231_vm0, %v3782_v8, -inf }
 0x48d   : > { %v1497_v17 = vpop.permute.xlu1 %1496  ;;  %v1607_v26 = vadd.f32 %v1606_v20, %v1605_v45  ;;  %v1608_v16 = vsel %vm231_vm0, %v3794_v22, 0.0  ;;  %v1670_v41 = vsel %vm231_vm0, %v3794_v22, -inf  ;;  %v1669_v48 = vmax.f32 %v1664_v2, %v1668_v62  ;;  %v3160_v62 = vld [vmem:[%s3230_s20 + $0x88] sm:$0xff] }
 0x48e   : > { %v3789_v18 = vpop.permute.xlu0 %1500  ;;  %v1671_v1 = vmax.f32 %v1665_v27, %v1670_v41  ;;  %v3862_v37 = vmul.f32 %v3156_v13, %v1497_v17 }
 0x48f   : > { %v1609_v51 = vadd.f32 %v1608_v16, %v1607_v26  ;;  %v1666_v16 = vsel %vm231_vm0, %v3775_v33, -inf }
 0x491   : > { %v3796_v40 = vpop.permute.xlu1 %1536 }
 0x492   : > { %v3798_v15 = vpop.permute.xlu0 %1540 }
 0x495   : > { %v1465_v49 = vpop.permute.xlu1 %1464 }
 0x496   : > { %v3803_v50 = vmul.f32 %v3148_v24, %v1465_v49  ;;  %v1469_v25 = vpop.permute.xlu0 %1468  ;;  %v1677_v49 = vmax.f32 %v1669_v48, %v1676_v43  ;;  %v3157_v24 = vld [vmem:[%s3230_s20 + $0x78] sm:$0xff]  ;;  %v1688_v43 = vsel %vm231_vm0, %v3862_v37, -inf }
 0x497   : > { %v3806_v55 = vmul.f32 %v3149_v54, %v1469_v25  ;;  %v3876_v17 = vmul.f32 %v3157_v24, %v3789_v18  ;;  %v3158_v54 = vld [vmem:[%s3230_s20 + $0xc0] sm:$0xff]  ;;  %v1686_v18 = vsel %vm231_vm0, %v3859_v12, -inf }
 0x498   : > { %v1610_v57 = vsel %vm231_vm0, %v3803_v50, 0.0  ;;  %v1672_v45 = vsel %vm231_vm0, %v3803_v50, -inf  ;;  %v3882_v58 = vmul.f32 %v3158_v54, %v3796_v40  ;;  %v3161_v40 = vld [vmem:[%s3230_s20 + $0xc8] sm:$0xff] }
 0x499   : > { %v1611_v30 = vadd.f32 %v1610_v57, %v1609_v51  ;;  %v1612_v31 = vsel %vm231_vm0, %v3806_v55, 0.0  ;;  %v1505_v60 = vpop.permute.xlu1 %1504  ;;  %v1674_v21 = vsel %vm231_vm0, %v3806_v55, -inf  ;;  %v1679_v51 = vmax.f32 %v1671_v1, %v1678_v0 }
 0x49a   : > { %v1509_v34 = vpop.permute.xlu0 %1508  ;;  %v1673_v11 = vmax.f32 %v1666_v16, %v1672_v45  ;;  %v1675_v61 = vmax.f32 %v1667_v4, %v1674_v21  ;;  %v3898_v38 = vmul.f32 %v3161_v40, %v3798_v15  ;;  %v1690_v2 = vsel %vm231_vm0, %v3876_v17, -inf  ;;  %v3163_v45 = vld [vmem:[%s3230_s20 + $0xd0] sm:$0xff]  ;;  %v3164_v16 = vld [vmem:[%s3230_s20 + $0x98] sm:$0xff] }
 0x49b   : > { %v1613_v14 = vadd.f32 %v1612_v31, %v1611_v30  ;;  %v3885_v30 = vmul.f32 %v3159_v29, %v1505_v60  ;;  %v1624_v31 = vsel %vm231_vm0, %v3859_v12, 0.0  ;;  %v1687_v48 = vmax.f32 %v1679_v51, %v1686_v18  ;;  %v3166_v29 = vld [vmem:[%s3230_s20 + $0xd8] sm:$0xff] }
 0x49c   : > { %v1681_v0 = vmax.f32 %v1673_v11, %v1680_v52 }
 0x49d   : > { %v1615_v44 = vadd.f32 %v1614_v36, %v1613_v14  ;;  %v1545_v3 = vpop.permute.xlu1 %1544  ;;  %v3890_v14 = vmul.f32 %v3160_v62, %v1509_v34  ;;  %v1626_v36 = vsel %vm231_vm0, %v3862_v37, 0.0  ;;  %v1628_v34 = vsel %vm231_vm0, %v3876_v17, 0.0 }
 0x49e   : > { %v3845_v56 = vpop.permute.xlu0 %1548  ;;  %v1692_v15 = vsel %vm231_vm0, %v3885_v30, -inf  ;;  %v1630_v13 = vsel %vm231_vm0, %v3885_v30, 0.0 }
 0x49f   : > { %v1617_v5 = vadd.f32 %v1616_v53, %v1615_v44  ;;  %v1708_v53 = vsel %vm231_vm0, %v3882_v58, -inf  ;;  %v1694_v1 = vsel %vm231_vm0, %v3890_v14, -inf  ;;  %v1632_v21 = vsel %vm231_vm0, %v3890_v14, 0.0 }
 0x4a1   : > { %v1619_v20 = vadd.f32 %v1618_v47, %v1617_v5  ;;  %v3868_v26 = vpop.permute.xlu1 %1552  ;;  %v1685_v47 = vmax.f32 %v1677_v49, %v1684_v6  ;;  %v3162_v5 = vld [vmem:[%s3230_s20 + $0x90] sm:$0xff]  ;;  %v1710_v6 = vsel %vm231_vm0, %v3898_v38, -inf  ;;  %v3165_v49 = vld [vmem:[%s3230_s20 + $0xa0] sm:$0xff] }
 0x4a2   : > { %v3878_v25 = vpop.permute.xlu0 %1556 }
 0x4a3   : > { %v1621_v57 = vadd.f32 %v1620_v9, %v1619_v20  ;;  %v3920_v20 = vmul.f32 %v3163_v45, %v1545_v3  ;;  %v3167_v3 = vld [vmem:[%s3230_s20 + $0xa8] sm:$0xff] }
 0x4a5   : > { %v1623_v60 = vadd.f32 %v1622_v35, %v1621_v57  ;;  %v1513_v41 = vpop.permute.xlu1 %1512  ;;  %v1683_v35 = vmax.f32 %v1675_v61, %v1682_v10  ;;  %v1693_v10 = vmax.f32 %v1685_v47, %v1692_v15  ;;  %v1695_v57 = vmax.f32 %v1687_v48, %v1694_v1  ;;  %v3168_v47 = vld [vmem:[%s3230_s20 + $0xe0] sm:$0xff] }
 0x4a6   : > { %v1517_v44 = vpop.permute.xlu0 %1516  ;;  %v3913_v9 = vmul.f32 %v3162_v5, %v1513_v41  ;;  %v1689_v61 = vmax.f32 %v1681_v0, %v1688_v43  ;;  %v3947_v43 = vmul.f32 %v3168_v47, %v3868_v26  ;;  %v3170_v5 = vld [vmem:[%s3230_s20 + $0xb8] sm:$0xff] }
 0x4a7   : > { %v1625_v27 = vadd.f32 %v1624_v31, %v1623_v60  ;;  %v3925_v4 = vmul.f32 %v3164_v16, %v1517_v44  ;;  %v3932_v31 = vmul.f32 %v3166_v29, %v3845_v56  ;;  %v1691_v18 = vmax.f32 %v1683_v35, %v1690_v2  ;;  %v3079_v16 = vld [vmem:[%s4303_s3 + $0xf0] sm:$0xff]  }
 0x4a8   : > { %v1696_v62 = vsel %vm231_vm0, %v3913_v9, -inf  ;;  %v1712_v60 = vsel %vm231_vm0, %v3920_v20, -inf  ;;  %v1634_v45 = vsel %vm231_vm0, %v3913_v9, 0.0  ;;  %2955 = vmatpush3.bf16.msra.mxu1 %v3079_v16 }
 0x4a9   : > { %v1627_v42 = vadd.f32 %v1626_v36, %v1625_v27  ;;  %v1521_v52 = vpop.permute.xlu1 %1520  ;;  %v1698_v2 = vsel %vm231_vm0, %v3925_v4, -inf  ;;  %v3169_v27 = vld [vmem:[%s3230_s20 + $0xb0] sm:$0xff]  ;;  %v1714_v35 = vsel %vm231_vm0, %v3932_v31, -inf  ;;  %v1697_v1 = vmax.f32 %v1689_v61, %v1696_v62  ;;  %2956 = vmatprep.subr.bf16.mxu1 %v3184_v19 }
 0x4aa   : > { %v3928_v24 = vmul.f32 %v3165_v49, %v1521_v52  ;;  %v1525_v51 = vpop.permute.xlu0 %1524  ;;  %v1636_v29 = vsel %vm231_vm0, %v3925_v4, 0.0  ;;  %v3172_v61 = vld [vmem:[%s3230_s20 + $0xf0] sm:$0xff] }
 0x4ab   : > { %v1629_v54 = vadd.f32 %v1628_v34, %v1627_v42  ;;  %v3935_v11 = vmul.f32 %v3167_v3, %v1525_v51  ;;  %v1699_v51 = vmax.f32 %v1691_v18, %v1698_v2  ;;  %v3081_v18 = vld [vmem:[%s4303_s3 + $0xf8] sm:$0xff]  }
 0x4ac   : > { %v1700_v36 = vsel %vm231_vm0, %v3928_v24, -inf  ;;  %2957 = vmatpush3.bf16.msra.mxu1 %v3081_v18 }
 0x4ad   : > { %v1631_v40 = vadd.f32 %v1630_v13, %v1629_v54  ;;  %v1701_v56 = vmax.f32 %v1693_v10, %v1700_v36  ;;  %v1702_v41 = vsel %vm231_vm0, %v3935_v11, -inf  ;;  %v1529_v34 = vpop.permute.xlu1 %1528  ;;  %v3171_v13 = vld [vmem:[%s3230_s20 + $0xe8] sm:$0xff]  ;;  %2962 = vmatprep.subr.bf16.mxu1 %v3184_v19 }
 0x4ae   : > { %v1703_v44 = vmax.f32 %v1695_v57, %v1702_v41  ;;  %v3952_v15 = vmul.f32 %v3169_v27, %v1529_v34  ;;  %v1533_v48 = vpop.permute.xlu0 %1532  ;;  %v3961_v26 = vmul.f32 %v3171_v13, %v3878_v25  ;;  %v3173_v34 = vld [vmem:[%s3230_s20 + $0xf8] sm:$0xff]  ;;  %v1640_v13 = vsel %vm231_vm0, %v3935_v11, 0.0  ;;  %s3188_s20 = smov 64  }
 0x4af   : > { %v1633_v0 = vadd.f32 %v1632_v21, %v1631_v40  ;;  %v3957_v42 = vmul.f32 %v3170_v5, %v1533_v48  ;;  %v1709_v52 = vmax.f32 %v1701_v56, %v1708_v53  ;;  %v3078_v21 = vld [vmem:[%s4303_s3 + $0x70] sm:$0xff]   ;;  %v1716_v53 = vsel %vm231_vm0, %v3947_v43, -inf }
 0x4b0   : > { %v1704_v10 = vsel %vm231_vm0, %v3952_v15, -inf  ;;  %v1711_v54 = vmax.f32 %v1703_v44, %v1710_v6  ;;  %2895 = vmatpush3.bf16.msra.mxu0 %v3078_v21  ;;  %v3080_v6 = vld [vmem:[%s4303_s3 + $0x78] sm:$0xff]   ;;  %v1718_v2 = vsel %vm231_vm0, %v3961_v26, -inf  ;;  %v1638_v44 = vsel %vm231_vm0, %v3928_v24, 0.0 }
 0x4b1   : > { %v1635_v49 = vadd.f32 %v1634_v45, %v1633_v0  ;;  %v1705_v25 = vmax.f32 %v1697_v1, %v1704_v10  ;;  %v1561_v57 = vpop.permute.xlu1 %1560  ;;  %v1706_v3 = vsel %vm231_vm0, %v3957_v42, -inf  ;;  %2896 = vmatprep.subr.bf16.mxu0 %v3184_v19  ;;  %v1717_v27 = vmax.f32 %v1709_v52, %v1716_v53 }
 0x4b2   : > { %v3980_v62 = vmul.f32 %v3172_v61, %v1561_v57  ;;  %v1565_v36 = vpop.permute.xlu0 %1564  ;;  %v1707_v56 = vmax.f32 %v1699_v51, %v1706_v3  ;;  %v1719_v1 = vmax.f32 %v1711_v54, %v1718_v2  ;;  %v1642_v52 = vsel %vm231_vm0, %v3952_v15, 0.0 }
 0x4b3   : > { %v1637_v40 = vadd.f32 %v1636_v29, %v1635_v49  ;;  %v1713_v41 = vmax.f32 %v1705_v25, %v1712_v60  ;;  %v3989_v47 = vmul.f32 %v3173_v34, %v1565_v36  ;;  %v1644_v51 = vsel %vm231_vm0, %v3957_v42, 0.0 }
 0x4b4   : > { %v1720_v48 = vsel %vm231_vm0, %v3980_v62, -inf  ;;  %v1715_v5 = vmax.f32 %v1707_v56, %v1714_v35  ;;  %2897 = vmatpush3.bf16.msra.mxu0 %v3080_v6  ;;  %v1724_v35 = vmax.f32 %v1717_v27, %v1719_v1  ;;  %v1646_v57 = vsel %vm231_vm0, %v3882_v58, 0.0 }
 0x4b5   : > { %v1639_v0 = vadd.f32 %v1638_v44, %v1637_v40  ;;  %v1721_v60 = vmax.f32 %v1713_v41, %v1720_v48  ;;  %v1722_v45 = vsel %vm231_vm0, %v3989_v47, -inf  ;;  %2902 = vmatprep.subr.bf16.mxu0 %v3184_v19  ;;  %v1648_v29 = vsel %vm231_vm0, %v3898_v38, 0.0 }
 0x4b6   : > { %v1723_v21 = vmax.f32 %v1715_v5, %v1722_v45  ;;  %v1650_v61 = vsel %vm231_vm0, %v3920_v20, 0.0  ;;  %v1652_v6 = vsel %vm231_vm0, %v3932_v31, 0.0  ;;  %v1654_v40 = vsel %vm231_vm0, %v3947_v43, 0.0  ;;  %v3083_v45 = vld [vmem:[%s4303_s3 + $0x100] sm:$0xff]  }
 0x4b7   : > { %v1641_v10 = vadd.f32 %v1640_v13, %v1639_v0  ;;  %v1656_v41 = vsel %vm231_vm0, %v3961_v26, 0.0  ;;  %v1658_v2 = vsel %vm231_vm0, %v3980_v62, 0.0  ;;  %v1660_v27 = vsel %vm231_vm0, %v3989_v47, 0.0 }
 0x4b8   : > { %v1725_v49 = vmax.f32 %v1721_v60, %v1723_v21  ;;  %v3082_v60 = vld [vmem:[%s4303_s3] sm:$0xff]  }
 0x4b9   : > { %v1643_v16 = vadd.f32 %v1642_v52, %v1641_v10  ;;  %v3084_v52 = vld [vmem:[%s4303_s3 + $0x8] sm:$0xff]  }
 0x4ba   : > { %v1726_v25 = vmax.f32 %v1724_v35, %v1725_v49  ;;  %v3086_v49 = vld [vmem:[%s4303_s3 + $0x10] sm:$0xff]  }
 0x4bb   : > { %v1645_v54 = vadd.f32 %v1644_v51, %v1643_v16  ;;  %v3085_v16 = vld [vmem:[%s4303_s3 + $0x108] sm:$0xff]   ;;  %v3087_v35 = vld [vmem:[%s4303_s3 + $0x110] sm:$0xff]   ;;  %v3088_v51 = vld [vmem:[%s4303_s3 + $0x18] sm:$0xff]  }
 0x4bc   : > { %1731 = vrot.lane.b32.xlu1 %v1726_v25, %s3188_s20  ;;  %v3090_v25 = vld [vmem:[%s4303_s3 + $0x20] sm:$0xff]  }
 0x4bd   : > { %v1647_v53 = vadd.f32 %v1646_v57, %v1645_v54  ;;  %v3089_v54 = vld [vmem:[%s4303_s3 + $0x118] sm:$0xff]   ;;  %v3091_v57 = vld [vmem:[%s4303_s3 + $0x120] sm:$0xff]  }
 0x4bf   : > { %v1649_v3 = vadd.f32 %v1648_v29, %v1647_v53  ;;  %v3092_v53 = vld [vmem:[%s4303_s3 + $0x28] sm:$0xff]  }
 0x4c0   : > { %v3093_v29 = vld [vmem:[%s4303_s3 + $0x128] sm:$0xff]  }
 0x4c1   : > { %v1651_v36 = vadd.f32 %v1650_v61, %v1649_v3  ;;  %v3094_v3 = vld [vmem:[%s4303_s3 + $0x30] sm:$0xff]  }
 0x4c2   : > { %v3095_v61 = vld [vmem:[%s4303_s3 + $0x130] sm:$0xff]  }
 0x4c3   : > { %v1653_v18 = vadd.f32 %v1652_v6, %v1651_v36  ;;  %v3096_v36 = vld [vmem:[%s4303_s3 + $0x38] sm:$0xff]  }
 0x4c4   : > { %v3097_v6 = vld [vmem:[%s4303_s3 + $0x138] sm:$0xff]  }
 0x4c5   : > { %v1655_v56 = vadd.f32 %v1654_v40, %v1653_v18 }
 0x4c7   : > { %v1657_v34 = vadd.f32 %v1656_v41, %v1655_v56  ;;  %v3098_v56 = vld [vmem:[%s4303_s3 + $0x80] sm:$0xff]  }
 0x4c8   : > { %v3099_v41 = vld [vmem:[%s4303_s3 + $0x140] sm:$0xff]  }
 0x4c9   : > { %v1659_v44 = vadd.f32 %v1658_v2, %v1657_v34 }
 0x4cb   : > { %v1661_v48 = vadd.f32 %v1660_v27, %v1659_v44  ;;  %v3100_v44 = vld [vmem:[%s4303_s3 + $0x88] sm:$0xff]  }
 0x4cc   : > { %v3101_v27 = vld [vmem:[%s4303_s3 + $0x148] sm:$0xff]  }
 0x4cd   : > { %v1663_v0 = vmul.f32 0.03125, %v1661_v48  ;;  %v3102_v48 = vld [vmem:[%s4303_s3 + $0x90] sm:$0xff]  }
 0x4cf   : > { %1729 = vst.msk [vmem:[#allocation2 + $0x3] sm:$0xff] %vm231_vm0, %v1663_v0  ;;  %v3103_v0 = vld [vmem:[%s4303_s3 + $0x150] sm:$0xff]  }
 0x52e   : > { %v1732_v1 = vpop.permute.xlu1 %1731 }
 0x52f   : > { %1735 = vst.msk [vmem:[#allocation2 + $0x3] sm:$0xff] %vm1734_vm14, %v1732_v1  ;;  %v3104_v1 = vld [vmem:[%s4303_s3 + $0x98] sm:$0xff]  }
 0x536   : > { %v1754_v5 = vld [vmem:[#allocation2 + $0x1] sm:$0xff] }
 0x537   : > { %v2057_v13 = vld [vmem:[#allocation2 + $0x3] sm:$0xff]  ;;  %v1755_v10 = vpack.c.bf16 %v1754_v5, %v1754_v5 }
 0x538   : > { %v2058_v21 = vpack.c.bf16 %v2057_v13, %v2057_v13  ;;  %v1736_v18 = vld [vmem:[#allocation2] sm:$0xff] }
 0x539   : > { %2899 = vmatmul.mubr.bf16.vlgmr.msra.gmra.mrb[8].mxu0 %v1755_v10  ;;  %v2165_v40 = vld [vmem:[#allocation2 + $0x4] sm:$0xff]  ;;  %v1737_v34 = vpack.c.bf16 %v1736_v18, %v1736_v18  ;;  %v3121_v18 = vld [vmem:[%s4303_s3 + $0x1b8] sm:$0xff]  }
 0x53a   : > { %2959 = vmatmul.mubr.bf16.vlgmr.msra.gmra.mrb[0].mxu1 %v2058_v21  ;;  %2903 = vmatpush3.bf16.msra.mxu0 %v3082_v60  ;;  %v2166_v2 = vpack.c.bf16 %v2165_v40, %v2165_v40  ;;  %v3105_v60 = vld [vmem:[%s4303_s3 + $0x158] sm:$0xff]   ;;  %v3106_v5 = vld [vmem:[%s4303_s3 + $0xa0] sm:$0xff]   ;;  %v3109_v10 = vld [vmem:[%s4303_s3 + $0x168] sm:$0xff]  }
 0x53b   : > { %2963 = vmatpush3.bf16.msra.mxu1 %v3083_v45  ;;  %2904 = vmatprep.subr.bf16.mxu0 %v3184_v19  ;;  %v3107_v13 = vld [vmem:[%s4303_s3 + $0x160] sm:$0xff]   ;;  %v3108_v45 = vld [vmem:[%s4303_s3 + $0xa8] sm:$0xff]   ;;  %v3110_v21 = vld [vmem:[%s4303_s3 + $0xb0] sm:$0xff]  }
 0x53c   : > { %2964 = vmatprep.subr.bf16.mxu1 %v3184_v19  ;;  %2918 = vmatprep.mubr.msk.bf16.mxu0 %vm3183_vm9, %v3184_v19  ;;  %v2381_v40 = vld [vmem:[#allocation2 + $0x6] sm:$0xff] }
 0x53d   : > { %2978 = vmatprep.mubr.msk.bf16.mxu1 %vm3183_vm9, %v3184_v19 }
 0x53e   : > { %2905 = vmatpush3.bf16.msra.mxu0 %v3084_v52  ;;  %v3111_v52 = vld [vmem:[%s4303_s3 + $0x170] sm:$0xff]  }
 0x53f   : > { %2965 = vmatpush3.bf16.msra.mxu1 %v3085_v16  ;;  %2906 = vmatprep.subr.bf16.mxu0 %v3184_v19  ;;  %v3112_v16 = vld [vmem:[%s4303_s3 + $0xb8] sm:$0xff]  }
 0x540   : > { %2966 = vmatprep.subr.bf16.mxu1 %v3184_v19 }
 0x542   : > { %2907 = vmatpush3.bf16.msra.mxu0 %v3086_v49  ;;  %v3113_v49 = vld [vmem:[%s4303_s3 + $0x178] sm:$0xff]  }
 0x543   : > { %2967 = vmatpush3.bf16.msra.mxu1 %v3087_v35  ;;  %2908 = vmatprep.subr.bf16.mxu0 %v3184_v19  ;;  %v1949_v35 = vld [vmem:[#allocation2 + $0x2] sm:$0xff] }
 0x544   : > { %2968 = vmatprep.subr.bf16.mxu1 %v3184_v19 }
 0x546   : > { %2909 = vmatpush3.bf16.msra.mxu0 %v3088_v51  ;;  %v2273_v51 = vld [vmem:[#allocation2 + $0x5] sm:$0xff] }
 0x547   : > { %2969 = vmatpush3.bf16.msra.mxu1 %v3089_v54  ;;  %2910 = vmatprep.subr.bf16.mxu0 %v3184_v19  ;;  %v3114_v54 = vld [vmem:[%s4303_s3 + $0x180] sm:$0xff]  }
 0x548   : > { %2970 = vmatprep.subr.bf16.mxu1 %v3184_v19 }
 0x54a   : > { %2911 = vmatpush3.bf16.msra.mxu0 %v3090_v25  ;;  %v1950_v25 = vpack.c.bf16 %v1949_v35, %v1949_v35 }
 0x54b   : > { %2971 = vmatpush3.bf16.msra.mxu1 %v3091_v57  ;;  %2912 = vmatprep.subr.bf16.mxu0 %v3184_v19  ;;  %v2274_v57 = vpack.c.bf16 %v2273_v51, %v2273_v51 }
 0x54c   : > { %2972 = vmatprep.subr.bf16.mxu1 %v3184_v19 }
 0x54e   : > { %2913 = vmatpush3.bf16.msra.mxu0 %v3092_v53  ;;  %v3115_v53 = vld [vmem:[%s4303_s3 + $0x188] sm:$0xff]  }
 0x54f   : > { %2973 = vmatpush3.bf16.msra.mxu1 %v3093_v29  ;;  %2914 = vmatprep.subr.bf16.mxu0 %v3184_v19  ;;  %v3116_v29 = vld [vmem:[%s4303_s3 + $0x190] sm:$0xff]  }
 0x550   : > { %2974 = vmatprep.subr.bf16.mxu1 %v3184_v19 }
 0x552   : > { %2915 = vmatpush3.bf16.msra.mxu0 %v3094_v3  ;;  %v3117_v3 = vld [vmem:[%s4303_s3 + $0x198] sm:$0xff]  }
 0x553   : > { %2975 = vmatpush3.bf16.msra.mxu1 %v3095_v61  ;;  %2916 = vmatprep.subr.bf16.mxu0 %v3184_v19  ;;  %v3118_v61 = vld [vmem:[%s4303_s3 + $0x1a0] sm:$0xff]  }
 0x554   : > { %2976 = vmatprep.subr.bf16.mxu1 %v3184_v19 }
 0x556   : > { %2917 = vmatpush3.bf16.msra.mxu0 %v3096_v36  ;;  %v3119_v36 = vld [vmem:[%s4303_s3 + $0x1a8] sm:$0xff]  }
 0x557   : > { %2977 = vmatpush3.bf16.msra.mxu1 %v3097_v6  ;;  %2922 = vmatprep.subr.bf16.mxu0 %v3184_v19  ;;  %v3120_v6 = vld [vmem:[%s4303_s3 + $0x1b0] sm:$0xff]  }
 0x558   : > { %2982 = vmatprep.subr.bf16.mxu1 %v3184_v19 }
 0x559   : > { %2919 = vmatmul.mubr.bf16.vlgmr.msra.gmra.mrb[8].mxu0 %v1737_v34 }
 0x55a   : > { %2979 = vmatmul.mubr.bf16.vlgmr.msra.gmra.mrb[0].mxu1 %v2166_v2  ;;  %2923 = vmatpush3.bf16.msra.mxu0 %v3098_v56  ;;  %v2382_v56 = vpack.c.bf16 %v2381_v40, %v2381_v40 }
 0x55b   : > { %2983 = vmatpush3.bf16.msra.mxu1 %v3099_v41  ;;  %2924 = vmatprep.subr.bf16.mxu0 %v3184_v19 }
 0x55c   : > { %2984 = vmatprep.subr.bf16.mxu1 %v3184_v19  ;;  %2938 = vmatprep.mubr.msk.bf16.mxu0 %vm3183_vm9, %v3184_v19 }
 0x55d   : > { %2998 = vmatprep.mubr.msk.bf16.mxu1 %vm3183_vm9, %v3184_v19 }
 0x55e   : > { %2925 = vmatpush3.bf16.msra.mxu0 %v3100_v44 }
 0x55f   : > { %2985 = vmatpush3.bf16.msra.mxu1 %v3101_v27  ;;  %2926 = vmatprep.subr.bf16.mxu0 %v3184_v19 }
 0x560   : > { %2986 = vmatprep.subr.bf16.mxu1 %v3184_v19 }
 0x562   : > { %2927 = vmatpush3.bf16.msra.mxu0 %v3102_v48 }
 0x563   : > { %2987 = vmatpush3.bf16.msra.mxu1 %v3103_v0  ;;  %2928 = vmatprep.subr.bf16.mxu0 %v3184_v19 }
 0x564   : > { %2988 = vmatprep.subr.bf16.mxu1 %v3184_v19 }
 0x566   : > { %2929 = vmatpush3.bf16.msra.mxu0 %v3104_v1 }
 0x567   : > { %2989 = vmatpush3.bf16.msra.mxu1 %v3105_v60  ;;  %2930 = vmatprep.subr.bf16.mxu0 %v3184_v19 }
 0x568   : > { %2990 = vmatprep.subr.bf16.mxu1 %v3184_v19 }
 0x56a   : > { %2931 = vmatpush3.bf16.msra.mxu0 %v3106_v5 }
 0x56b   : > { %2991 = vmatpush3.bf16.msra.mxu1 %v3107_v13  ;;  %2932 = vmatprep.subr.bf16.mxu0 %v3184_v19 }
 0x56c   : > { %2992 = vmatprep.subr.bf16.mxu1 %v3184_v19 }
 0x56e   : > { %2933 = vmatpush3.bf16.msra.mxu0 %v3108_v45 }
 0x56f   : > { %2993 = vmatpush3.bf16.msra.mxu1 %v3109_v10  ;;  %2934 = vmatprep.subr.bf16.mxu0 %v3184_v19 }
 0x570   : > { %2994 = vmatprep.subr.bf16.mxu1 %v3184_v19 }
 0x572   : > { %2935 = vmatpush3.bf16.msra.mxu0 %v3110_v21 }
 0x573   : > { %2995 = vmatpush3.bf16.msra.mxu1 %v3111_v52  ;;  %2936 = vmatprep.subr.bf16.mxu0 %v3184_v19 }
 0x574   : > { %2996 = vmatprep.subr.bf16.mxu1 %v3184_v19 }
 0x576   : > { %2937 = vmatpush3.bf16.msra.mxu0 %v3112_v16 }
 0x577   : > { %2997 = vmatpush3.bf16.msra.mxu1 %v3113_v49 }
 0x578   : > { %3002 = vmatprep.subr.bf16.mxu1 %v3184_v19 }
 0x579   : > { %2939 = vmatmul.mubr.bf16.vlgmr.msra.gmra.mrb[8].mxu0 %v1950_v25 }
 0x57a   : > { %2999 = vmatmul.mubr.bf16.vlgmr.msra.gmra.mrb[0].mxu1 %v2274_v57 }
 0x57b   : > { %3003 = vmatpush3.bf16.msra.mxu1 %v3114_v54  ;;  %3018 = vmatprep.mubr.msk.bf16.mxu1 %vm3183_vm9, %v3184_v19 }
 0x57c   : > { %3004 = vmatprep.subr.bf16.mxu1 %v3184_v19 }
 0x57f   : > { %3005 = vmatpush3.bf16.msra.mxu1 %v3115_v53 }
 0x580   : > { %3006 = vmatprep.subr.bf16.mxu1 %v3184_v19 }
 0x583   : > { %3007 = vmatpush3.bf16.msra.mxu1 %v3116_v29 }
 0x584   : > { %3008 = vmatprep.subr.bf16.mxu1 %v3184_v19 }
 0x587   : > { %3009 = vmatpush3.bf16.msra.mxu1 %v3117_v3 }
 0x588   : > { %3010 = vmatprep.subr.bf16.mxu1 %v3184_v19 }
 0x58b   : > { %3011 = vmatpush3.bf16.msra.mxu1 %v3118_v61 }
 0x58c   : > { %3012 = vmatprep.subr.bf16.mxu1 %v3184_v19 }
 0x58f   : > { %3013 = vmatpush3.bf16.msra.mxu1 %v3119_v36 }
 0x590   : > { %3014 = vmatprep.subr.bf16.mxu1 %v3184_v19 }
 0x593   : > { %3015 = vmatpush3.bf16.msra.mxu1 %v3120_v6 }
 0x594   : > { %3016 = vmatprep.subr.bf16.mxu1 %v3184_v19 }
 0x597   : > { %3017 = vmatpush3.bf16.msra.mxu1 %v3121_v18 }
 0x59a   : > { %3019 = vmatmul.mubr.bf16.vlgmr.msra.gmra.mrb[0].mxu1 %v2382_v56 }
 0x64c   : > { %v2050_v41 = vpop.f32.mrb[8].mxu0 }
 0x64d   : > { %v2940_v34 = vpop.f32.mrb[9].mxu0 }
 0x64e   : > { %v2053_v2 = vpop.f32.mrb[10].mxu0 }
 0x64f   : > { %v2941_v44 = vpop.f32.mrb[11].mxu0 }
 0x66d   : > { %v2482_v27 = vpop.f32.mrb[0].mxu1 }
 0x66e   : > { %v3028_v48 = vadd.f32 %v2482_v27, %v2050_v41  ;;  %v3020_v0 = vpop.f32.mrb[1].mxu1 }
 0x66f   : > { %v2485_v1 = vpop.f32.mrb[2].mxu1 }
 0x670   : > { %v2785_v60 = vmul.f32 -1.442695, %v3028_v48  ;;  %v3021_v5 = vpop.f32.mrb[3].mxu1 }
 0x672   : > { %3138 = vpow2.f32 %v2785_v60 }
 0x67c   : > { %v3139_v13 = vpop.eup %3138 }
 0x67d   : > { %v2492_v45 = vadd.f32 1.0, %v3139_v13 }
 0x67f   : > { %3140 = vrcp.f32 %v2492_v45 }
 0x689   : > { %v3141_v19 = vpop.eup %3140 }
 0x68a   : > { %v2495_v10 = vmul.f32 %v3141_v19, %v3770_v28  ;;  %v2496_v21 = vmul.f32 %v3141_v19, %v3765_v23  ;;  %v2497_v52 = vmul.f32 %v3141_v19, %v3775_v33  ;;  %v2498_v16 = vmul.f32 %v3141_v19, %v3782_v8 }
 0x68b   : > { %v2499_v49 = vmul.f32 %v3141_v19, %v3787_v32  ;;  %v2500_v35 = vmul.f32 %v3141_v19, %v3794_v22  ;;  %v2501_v51 = vmul.f32 %v3141_v19, %v3803_v50  ;;  %v2502_v54 = vmul.f32 %v3141_v19, %v3806_v55 }
 0x68c   : > { %v2503_v28 = vmul.f32 %v3141_v19, %v3809_v59  ;;  %v2504_v23 = vmul.f32 %v3141_v19, %v3819_v39  ;;  %v2505_v33 = vmul.f32 %v3141_v19, %v3814_v7  ;;  %v2506_v8 = vmul.f32 %v3141_v19, %v3829_v46  ;;  %2527 = vst.msk [vmem:[%s4199_s7] sm:$0xff] %vm231_vm0, %v2495_v10 }
 0x68d   : > { %2528 = vst.msk [vmem:[%s4199_s7 + $0x8] sm:$0xff] %vm231_vm0, %v2496_v21  ;;  %2529 = vst.msk [vmem:[%s4199_s7 + $0x10] sm:$0xff] %vm231_vm0, %v2497_v52  ;;  %v2507_v32 = vmul.f32 %v3141_v19, %v3822_v63  ;;  %v2508_v22 = vmul.f32 %v3141_v19, %v3859_v12  ;;  %v2509_v50 = vmul.f32 %v3141_v19, %v3862_v37 }
 0x68e   : > { %2530 = vst.msk [vmem:[%s4199_s7 + $0x18] sm:$0xff] %vm231_vm0, %v2498_v16  ;;  %v2510_v55 = vmul.f32 %v3141_v19, %v3876_v17  ;;  %2531 = vst.msk [vmem:[%s4199_s7 + $0x20] sm:$0xff] %vm231_vm0, %v2499_v49  ;;  %v2511_v59 = vmul.f32 %v3141_v19, %v3885_v30  ;;  %v2512_v7 = vmul.f32 %v3141_v19, %v3890_v14 }
 0x68f   : > { %2532 = vst.msk [vmem:[%s4199_s7 + $0x28] sm:$0xff] %vm231_vm0, %v2500_v35  ;;  %2533 = vst.msk [vmem:[%s4199_s7 + $0x30] sm:$0xff] %vm231_vm0, %v2501_v51  ;;  %v2513_v39 = vmul.f32 %v3141_v19, %v3913_v9  ;;  %v2514_v63 = vmul.f32 %v3141_v19, %v3925_v4  ;;  %v2515_v46 = vmul.f32 %v3141_v19, %v3928_v24 }
 0x690   : > { %2534 = vst.msk [vmem:[%s4199_s7 + $0x38] sm:$0xff] %vm231_vm0, %v2502_v54  ;;  %2535 = vst.msk [vmem:[%s4199_s7 + $0x40] sm:$0xff] %vm231_vm0, %v2503_v28  ;;  %v2516_v12 = vmul.f32 %v3141_v19, %v3935_v11  ;;  %v2517_v37 = vmul.f32 %v3141_v19, %v3952_v15  ;;  %v2518_v17 = vmul.f32 %v3141_v19, %v3957_v42 }
 0x691   : > { %2536 = vst.msk [vmem:[%s4199_s7 + $0x48] sm:$0xff] %vm231_vm0, %v2504_v23  ;;  %2537 = vst.msk [vmem:[%s4199_s7 + $0x50] sm:$0xff] %vm231_vm0, %v2505_v33  ;;  %v2519_v30 = vmul.f32 %v3141_v19, %v3882_v58  ;;  %v2520_v14 = vmul.f32 %v3141_v19, %v3898_v38  ;;  %v2521_v9 = vmul.f32 %v3141_v19, %v3920_v20 }
 0x692   : > { %2538 = vst.msk [vmem:[%s4199_s7 + $0x58] sm:$0xff] %vm231_vm0, %v2506_v8  ;;  %2539 = vst.msk [vmem:[%s4199_s7 + $0x60] sm:$0xff] %vm231_vm0, %v2507_v32  ;;  %v2522_v4 = vmul.f32 %v3141_v19, %v3932_v31  ;;  %v2523_v58 = vmul.f32 %v3141_v19, %v3947_v43  ;;  %v2524_v38 = vmul.f32 %v3141_v19, %v3961_v26 }
 0x693   : > { %2540 = vst.msk [vmem:[%s4199_s7 + $0x68] sm:$0xff] %vm231_vm0, %v2508_v22  ;;  %2541 = vst.msk [vmem:[%s4199_s7 + $0x70] sm:$0xff] %vm231_vm0, %v2509_v50  ;;  %v2525_v20 = vmul.f32 %v3141_v19, %v3980_v62  ;;  %v2526_v24 = vmul.f32 %v3141_v19, %v3989_v47 }
 0x694   : > { %2542 = vst.msk [vmem:[%s4199_s7 + $0x78] sm:$0xff] %vm231_vm0, %v2510_v55  ;;  %2543 = vst.msk [vmem:[%s4199_s7 + $0x80] sm:$0xff] %vm231_vm0, %v2511_v59 }
 0x695   : > { %2544 = vst.msk [vmem:[%s4199_s7 + $0x88] sm:$0xff] %vm231_vm0, %v2512_v7  ;;  %2545 = vst.msk [vmem:[%s4199_s7 + $0x90] sm:$0xff] %vm231_vm0, %v2513_v39 }
 0x696   : > { %2546 = vst.msk [vmem:[%s4199_s7 + $0x98] sm:$0xff] %vm231_vm0, %v2514_v63  ;;  %2547 = vst.msk [vmem:[%s4199_s7 + $0xa0] sm:$0xff] %vm231_vm0, %v2515_v46 }
 0x697   : > { %2548 = vst.msk [vmem:[%s4199_s7 + $0xa8] sm:$0xff] %vm231_vm0, %v2516_v12  ;;  %2549 = vst.msk [vmem:[%s4199_s7 + $0xb0] sm:$0xff] %vm231_vm0, %v2517_v37 }
 0x698   : > { %2550 = vst.msk [vmem:[%s4199_s7 + $0xb8] sm:$0xff] %vm231_vm0, %v2518_v17  ;;  %2551 = vst.msk [vmem:[%s4199_s7 + $0xc0] sm:$0xff] %vm231_vm0, %v2519_v30 }
 0x699   : > { %2552 = vst.msk [vmem:[%s4199_s7 + $0xc8] sm:$0xff] %vm231_vm0, %v2520_v14  ;;  %2553 = vst.msk [vmem:[%s4199_s7 + $0xd0] sm:$0xff] %vm231_vm0, %v2521_v9 }
 0x69a   : > { %2554 = vst.msk [vmem:[%s4199_s7 + $0xd8] sm:$0xff] %vm231_vm0, %v2522_v4  ;;  %2555 = vst.msk [vmem:[%s4199_s7 + $0xe0] sm:$0xff] %vm231_vm0, %v2523_v58 }
 0x69b   : > { %2556 = vst.msk [vmem:[%s4199_s7 + $0xe8] sm:$0xff] %vm231_vm0, %v2524_v38  ;;  %2557 = vst.msk [vmem:[%s4199_s7 + $0xf0] sm:$0xff] %vm231_vm0, %v2525_v20 }
 0x69c   : > { %2558 = vst.msk [vmem:[%s4199_s7 + $0xf8] sm:$0xff] %vm231_vm0, %v2526_v24 }
 0x69d PF: > { %s14_s15 = sadd.s32 1, %s3180_s15  }
 0x69e   : > { %p11_p4 = scmp.ge.s32.totalorder %s14_s15, 4  }
 0x6a0   :  { %13 = sbr.rel (!%p11_p4) target bundleno = 1 (0x1), region = 72 }

</bundles_post_ra>
